<compile_context>
chip_gen: v7x
topology: tpu7x:2x2x1
jax: 0.10.0
libtpu: 0.0.40
codegen_flags: <defaults>
</compile_context>

<pallas_src>
import jax
import jax.numpy as jnp
from jax.experimental import pallas as pl
from jax.experimental.pallas import tpu as pltpu


# ----------------------------------------------------------------------------
# Frame geometry (all lengths padded to multiples of 128 lanes)
#
# For a logical (H, W) image, Wp = W + 2 and image pixel (h, w) lives at
#   OFrame index (h+1)*Wp + (w+1)   (zero-padded canvas, length Lop)
#   IFrame index (h+2)*Wp + (w+2)   (OFrame with extra slack,  length Lip)
# IFrame has the slack a kernel needs to *produce* a full OFrame while reading
# all 9 shifted windows in-bounds; everything outside real pixels is zero.
# ----------------------------------------------------------------------------
def _round_up(x, m):
    return (x + m - 1) // m * m


def _frame_geometry(H, W):
    Wp = W + 2
    Lp = _round_up(H * Wp, 128)                                   # compact out
    Lop = _round_up(max((H + 3) * Wp, Lp + 2 * Wp + 2), 128)      # OFrame
    Lip = _round_up(Lop + 2 * Wp + 2, 128)                        # IFrame
    return Wp, Lp, Lop, Lip


def _to_iframe(x_nchw, dtype=jnp.bfloat16):
    # NOTE: the conv input *and* the residual are bf16-rounded here; pass f32
    # if tighter parity with the f32 torch reference is ever required.
    n, c, h, w = x_nchw.shape
    wp, _, _, lip = _frame_geometry(h, w)
    xp = jnp.pad(x_nchw.astype(dtype), ((0, 0), (0, 0), (1, 2), (1, 1)))
    flat = xp.reshape(n, c, (h + 3) * wp)
    lead = wp + 1
    tail = lip - lead - (h + 3) * wp
    return jnp.pad(flat, ((0, 0), (0, 0), (lead, tail)))


def _oframe_mask(H, W):
    wp, _, lop, _ = _frame_geometry(H, W)
    q = jnp.arange(lop, dtype=jnp.int32)
    row = q // wp
    col = q % wp
    ok = (row >= 1) & (row <= H) & (col >= 1) & (col <= W)
    return ok.astype(jnp.float32).reshape(1, lop)


def _bn_fold(gamma, beta, mean, var, eps=1e-5):
    scale = gamma / jnp.sqrt(var + eps)
    shift = beta - mean * scale
    return scale, shift


def _cout_splits(cout):
    # 2-way output-channel grid split keeps both v7x TensorCores busy with
    # work independent of the batch; gated so each half is >= 8 sublanes.
    return 2 if cout % 16 == 0 else 1


# ----------------------------------------------------------------------------
# Weight packing (wrapper-side, tiny)
# ----------------------------------------------------------------------------
def _conv_weight_stacked(w_oihw, scale):
    """Conv2d weight (O,I,3,3) with BN scale folded -> (O, 9*I) bf16, tap-major."""
    w = w_oihw * scale[:, None, None, None]
    o, i = w.shape[0], w.shape[1]
    taps = jnp.transpose(w, (2, 3, 0, 1)).reshape(9, o, i)          # k = kh*3+kw
    return jnp.transpose(taps, (1, 0, 2)).reshape(o, 9 * i).astype(jnp.bfloat16)


def _convT_taps(w_iohw, scale):
    """ConvTranspose2d weight (I,O,3,3) -> flipped fwd-conv taps (9, O, I) f32."""
    wf = jnp.flip(w_iohw, (2, 3)) * scale[None, :, None, None]
    i, o = wf.shape[0], wf.shape[1]
    return jnp.transpose(wf, (2, 3, 1, 0)).reshape(9, o, i)


# parity p = 2*r + s (r = out_row % 2, s = out_col % 2): list of
# (tap k = kh*3+kw of the flipped kernel, dh, dw); contribution is
# Kf[kh,kw] @ input[a+dh, b+dw] for output pixel (2a+r, 2b+s).
_PARITY_TAPS = (
    ((4, 0, 0),),
    ((3, 0, 0), (5, 0, 1)),
    ((1, 0, 0), (7, 1, 0)),
    ((0, 0, 0), (2, 0, 1), (6, 1, 0), (8, 1, 1)),
)


def _deconv_weight_stacked(w_main_iohw, s_main, w_up_iohw, s_up):
    """Both ConvTranspose branches + 4 parities as ONE (4*O, 8*I) matrix.

    Row index = c*4 + p (channel-major so a Cout grid split stays contiguous);
    column block j = 2*dh + dw holds the y-branch window, block 4+j the
    x-branch (upsample) window; unused (parity, shift) blocks are zero.
    """
    tm = _convT_taps(w_main_iohw, s_main)
    tu = _convT_taps(w_up_iohw, s_up)
    o, i = tm.shape[1], tm.shape[2]
    wbig = jnp.zeros((o, 4, 8, i), jnp.float32)
    for p, taps in enumerate(_PARITY_TAPS):
        for (k, dh, dw) in taps:
            j = 2 * dh + dw
            wbig = wbig.at[:, p, j, :].set(tm[k])
            wbig = wbig.at[:, p, 4 + j, :].set(tu[k])
    return wbig.reshape(4 * o, 8 * i).astype(jnp.bfloat16)


# ----------------------------------------------------------------------------
# Kernel 1: 3x3 conv + BN shift + LeakyReLU, emitted as a zero-padded OFrame
# ----------------------------------------------------------------------------
def _make_conv_frame_kernel(H, W, n_img):
    Wp, _, Lop, _ = _frame_geometry(H, W)

    def kernel(x_ref, w_ref, shift_ref, mask_ref, out_ref, xs_ref):
        cin = x_ref.shape[1]
        # Build the (9*Cin, N*Lop) stacked operand once per step (batch folded
        # into lanes); all destination lane offsets are 128-aligned.
        for n in range(n_img):
            for k in range(9):
                off = (k // 3) * Wp + (k % 3)
                xs_ref[k * cin:(k + 1) * cin, n * Lop:(n + 1) * Lop] = \
                    x_ref[n, :, off:off + Lop]
        # One wide-K MXU push for all taps and all images.
        acc = jnp.dot(w_ref[...], xs_ref[...],
                      preferred_element_type=jnp.float32)
        v = acc + shift_ref[...]                       # folded-BN shift (Cb, 1)
        v = jnp.where(v > 0.0, v, 0.2 * v)             # LeakyReLU(0.2)
        for n in range(n_img):
            out_ref[n] = (v[:, n * Lop:(n + 1) * Lop]
                          * mask_ref[...]).astype(out_ref.dtype)

    return kernel


def conv_bn_act_to_frame(x_iframe, w_stk, shift, H, W):
    """lrelu(BN(conv3x3(x))) emitted directly as zero-padded OFrames (bf16)."""
    N, Cin, Lip = x_iframe.shape
    Cout = w_stk.shape[0]
    _, _, Lop, Lip_e = _frame_geometry(H, W)
    assert Lip == Lip_e
    splits = _cout_splits(Cout)
    Cb = Cout // splits
    shift = shift.reshape(Cout, 1).astype(jnp.float32)
    mask = _oframe_mask(H, W)
    return pl.pallas_call(
        _make_conv_frame_kernel(H, W, N),
        out_shape=jax.ShapeDtypeStruct((N, Cout, Lop), jnp.bfloat16),
        grid=(splits,),
        in_specs=[
            pl.BlockSpec((N, Cin, Lip), lambda s: (0, 0, 0)),
            pl.BlockSpec((Cb, 9 * Cin), lambda s: (s, 0)),
            pl.BlockSpec((Cb, 1), lambda s: (s, 0)),
            pl.BlockSpec((1, Lop), lambda s: (0, 0)),
        ],
        out_specs=pl.BlockSpec((N, Cb, Lop), lambda s: (0, s, 0)),
        scratch_shapes=[pltpu.VMEM((9 * Cin, N * Lop), jnp.bfloat16)],
        compiler_params=pltpu.CompilerParams(
            dimension_semantics=("parallel",)),
    )(x_iframe, w_stk, shift, mask)


# ----------------------------------------------------------------------------
# Kernel 2: 3x3 conv + BN shift + residual add + LeakyReLU (compact output)
# ----------------------------------------------------------------------------
def _make_conv_res_kernel(H, W, n_img):
    Wp, Lp, _, _ = _frame_geometry(H, W)
    res_off = 2 * Wp + 2          # IFrame index of image pixel (0, 0)

    def kernel(y_ref, x_ref, w_ref, shift_ref, out_ref, ys_ref):
        cin = y_ref.shape[1]
        for n in range(n_img):
            for k in range(9):
                off = (k // 3) * Wp + (k % 3)
                ys_ref[k * cin:(k + 1) * cin, n * Lp:(n + 1) * Lp] = \
                    y_ref[n, :, off:off + Lp]
        acc = jnp.dot(w_ref[...], ys_ref[...],
                      preferred_element_type=jnp.float32)
        v = acc + shift_ref[...]
        for n in range(n_img):
            v_n = v[:, n * Lp:(n + 1) * Lp] \
                + x_ref[n, :, res_off:res_off + Lp].astype(jnp.float32)
            v_n = jnp.where(v_n > 0.0, v_n, 0.2 * v_n)
            out_ref[n] = v_n.astype(out_ref.dtype)

    return kernel


def conv_bn_res_act(y_oframe, x_iframe, w_stk, shift, H, W):
    """lrelu(BN(conv3x3(y)) + x) -> compact (N, Cout, Lp) bf16."""
    N, Cin, Lop = y_oframe.shape
    Cout = w_stk.shape[0]
    _, Lp, Lop_e, Lip = _frame_geometry(H, W)
    assert Lop == Lop_e and x_iframe.shape == (N, Cout, Lip)
    splits = _cout_splits(Cout)
    Cb = Cout // splits
    shift = shift.reshape(Cout, 1).astype(jnp.float32)
    return pl.pallas_call(
        _make_conv_res_kernel(H, W, N),
        out_shape=jax.ShapeDtypeStruct((N, Cout, Lp), jnp.bfloat16),
        grid=(splits,),
        in_specs=[
            pl.BlockSpec((N, Cin, Lop), lambda s: (0, 0, 0)),
            pl.BlockSpec((N, Cb, Lip), lambda s: (0, s, 0)),   # residual split
            pl.BlockSpec((Cb, 9 * Cin), lambda s: (s, 0)),
            pl.BlockSpec((Cb, 1), lambda s: (s, 0)),
        ],
        out_specs=pl.BlockSpec((N, Cb, Lp), lambda s: (0, s, 0)),
        scratch_shapes=[pltpu.VMEM((9 * Cin, N * Lp), jnp.bfloat16)],
        compiler_params=pltpu.CompilerParams(
            dimension_semantics=("parallel",)),
    )(y_oframe, x_iframe, w_stk, shift)


# ----------------------------------------------------------------------------
# Kernel 3: fused dual ConvTranspose2d(k3,s2,p1,op1) + BNs + add + LeakyReLU.
# One matmul covers both branches and all 4 output parities.
# ----------------------------------------------------------------------------
def _make_deconv_kernel(H, W, n_img):
    Wp, Lp, _, _ = _frame_geometry(H, W)
    y_base = Wp + 1               # OFrame index of image pixel (0, 0)
    x_base = 2 * Wp + 2           # IFrame index of image pixel (0, 0)
    shifts = (0, 1, Wp, Wp + 1)   # j = 2*dh + dw

    def kernel(y_ref, x_ref, w_ref, shift_ref, out_ref, st_ref):
        cin = y_ref.shape[1]
        for n in range(n_img):
            for j, d in enumerate(shifts):
                st_ref[j * cin:(j + 1) * cin, n * Lp:(n + 1) * Lp] = \
                    y_ref[n, :, y_base + d:y_base + d + Lp]
                st_ref[(4 + j) * cin:(5 + j) * cin, n * Lp:(n + 1) * Lp] = \
                    x_ref[n, :, x_base + d:x_base + d + Lp]
        acc = jnp.dot(w_ref[...], st_ref[...],
                      preferred_element_type=jnp.float32)   # (4*Cb, N*Lp)
        v = acc + shift_ref[...]                            # (4*Cb, 1)
        v = jnp.where(v > 0.0, v, 0.2 * v)
        vb = v.astype(out_ref.dtype)
        for n in range(n_img):
            out_ref[n] = vb[:, n * Lp:(n + 1) * Lp]

    return kernel


def deconv_pair_bn_add_act(y_oframe, x_iframe, w_big, shift, H, W):
    """lrelu(BN1(convT1(y)) + BNup(convT_up(x))) -> (N, 4*Cout, Lp) bf16,
    row index c*4 + p with parity p = 2*(row%2) + (col%2)."""
    N, Cin, Lop = y_oframe.shape
    Cout = w_big.shape[0] // 4
    _, Lp, Lop_e, Lip = _frame_geometry(H, W)
    assert Lop == Lop_e and x_iframe.shape == (N, Cin, Lip)
    splits = _cout_splits(Cout)
    Cb = Cout // splits
    # Adding the two BN shifts is valid only because both precede the shared
    # LeakyReLU; shift is tiled per parity (same per-channel value).
    shift4 = jnp.repeat(shift.astype(jnp.float32), 4).reshape(4 * Cout, 1)
    return pl.pallas_call(
        _make_deconv_kernel(H, W, N),
        out_shape=jax.ShapeDtypeStruct((N, 4 * Cout, Lp), jnp.bfloat16),
        grid=(splits,),
        in_specs=[
            pl.BlockSpec((N, Cin, Lop), lambda s: (0, 0, 0)),
            pl.BlockSpec((N, Cin, Lip), lambda s: (0, 0, 0)),
            pl.BlockSpec((4 * Cb, 8 * Cin), lambda s: (s, 0)),
            pl.BlockSpec((4 * Cb, 1), lambda s: (s, 0)),
        ],
        out_specs=pl.BlockSpec((N, 4 * Cb, Lp), lambda s: (0, s, 0)),
        scratch_shapes=[pltpu.VMEM((8 * Cin, N * Lp), jnp.bfloat16)],
        compiler_params=pltpu.CompilerParams(
            dimension_semantics=("parallel",)),
    )(y_oframe, x_iframe, w_big, shift4)


# ----------------------------------------------------------------------------
# Full forward (matches ResidualBlockDecoder.forward, inference-mode BN)
# ----------------------------------------------------------------------------
def residual_block_decoder(x_nchw, params, upsample):
    N, Cin, H, W = x_nchw.shape
    Wp, Lp, _, _ = _frame_geometry(H, W)

    s2, b2 = _bn_fold(*params["bn2"])
    s1, b1 = _bn_fold(*params["bn1"])

    x_if = _to_iframe(x_nchw)                                  # (N, Cin, Lip) bf16
    w2 = _conv_weight_stacked(params["w2"], s2)

    # conv2 -> bn2 -> lrelu, emitted directly in the padded frame layout that
    # the next kernel consumes (no pad / transpose HBM round trip in between).
    y_of = conv_bn_act_to_frame(x_if, w2, b2, H, W)            # (N, Cin, Lop)

    if not upsample:
        w1 = _conv_weight_stacked(params["w1"], s1)
        Cout = w1.shape[0]
        out = conv_bn_res_act(y_of, x_if, w1, b1, H, W)        # (N, Cout, Lp)
        out = out[:, :, :H * Wp].reshape(N, Cout, H, Wp)[:, :, :, :W]
    else:
        su, bu = _bn_fold(*params["bn_up"])
        wbig = _deconv_weight_stacked(params["w1"], s1, params["w_up"], su)
        Cout = wbig.shape[0] // 4
        par = deconv_pair_bn_add_act(y_of, x_if, wbig, b1 + bu, H, W)
        # Undo the (channel, parity) packing: rows are c*4 + (2r + s).
        par = par[:, :, :H * Wp].reshape(N, Cout, 2, 2, H, Wp)[..., :W]
        out = jnp.transpose(par, (0, 1, 4, 2, 5, 3)).reshape(N, Cout, 2 * H, 2 * W)
    return out.astype(jnp.float32)


# ----------------------------------------------------------------------------
# Pure-JAX (f32, lax.conv) reference for correctness checking only
# ----------------------------------------------------------------------------
def _ref_conv(x, w_oihw):
    return jax.lax.conv_general_dilated(
        x, w_oihw, (1, 1), ((1, 1), (1, 1)),
        dimension_numbers=("NCHW", "OIHW", "NCHW"))


def _ref_convT(x, w_iohw):
    w = jnp.transpose(jnp.flip(w_iohw, (2, 3)), (1, 0, 2, 3))  # -> OIHW
    return jax.lax.conv_general_dilated(
        x, w, (1, 1), ((1, 2), (1, 2)), lhs_dilation=(2, 2),
        dimension_numbers=("NCHW", "OIHW", "NCHW"))


def _ref_bn(x, gamma, beta, mean, var, eps=1e-5):
    inv = gamma / jnp.sqrt(var + eps)
    return (x - mean[None, :, None, None]) * inv[None, :, None, None] \
        + beta[None, :, None, None]


def _ref_lrelu(x):
    return jnp.where(x > 0, x, 0.2 * x)


def residual_block_decoder_ref(x, params, upsample):
    y = _ref_lrelu(_ref_bn(_ref_conv(x, params["w2"]), *params["bn2"]))
    if not upsample:
        y = _ref_bn(_ref_conv(y, params["w1"]), *params["bn1"])
        res = x
    else:
        y = _ref_bn(_ref_convT(y, params["w1"]), *params["bn1"])
        res = _ref_bn(_ref_convT(x, params["w_up"]), *params["bn_up"])
    return _ref_lrelu(y + res)


# ----------------------------------------------------------------------------
# Deterministic parameter construction
# ----------------------------------------------------------------------------
def make_params(key, cin, cout, upsample):
    ks = jax.random.split(key, 12)

    def bn(k, c):
        k1, k2, k3, k4 = jax.random.split(k, 4)
        gamma = 1.0 + 0.1 * jax.random.normal(k1, (c,), jnp.float32)
        beta = 0.1 * jax.random.normal(k2, (c,), jnp.float32)
        mean = 0.1 * jax.random.normal(k3, (c,), jnp.float32)
        var = 0.5 + jax.random.uniform(k4, (c,), jnp.float32)
        return (gamma, beta, mean, var)

    p = {
        "w2": 0.1 * jax.random.normal(ks[0], (cin, cin, 3, 3), jnp.float32),
        "bn2": bn(ks[1], cin),
        "bn1": bn(ks[3], cout),
    }
    if not upsample:
        p["w1"] = 0.1 * jax.random.normal(ks[2], (cout, cin, 3, 3), jnp.float32)
    else:
        p["w1"] = 0.1 * jax.random.normal(ks[2], (cin, cout, 3, 3), jnp.float32)
        p["w_up"] = 0.1 * jax.random.normal(ks[4], (cin, cout, 3, 3), jnp.float32)
        p["bn_up"] = bn(ks[5], cout)
    return p


# ----------------------------------------------------------------------------
if __name__ == "__main__":
    key = jax.random.PRNGKey(0)
    kx1, kx2, kx3, kx4, kp1, kp2, kp3, kp4 = jax.random.split(key, 8)

    fwd = jax.jit(residual_block_decoder, static_argnames=("upsample",))

    def check(out, ref):
        # bf16 operands / bf16 stores bound per-element error to ~0.5% of |ref|.
        err = jnp.abs(jnp.asarray(out, jnp.float32) - ref)
        assert float(jnp.max(err / (1.0 + jnp.abs(ref)))) < 4e-2
        assert float(jnp.mean(err)) / float(jnp.mean(jnp.abs(ref))) < 2e-2

    # 1) plain residual block (stride 1), in == out channels
    x1 = jax.random.normal(kx1, (2, 4, 16, 16), jnp.float32)
    p1 = make_params(kp1, cin=4, cout=4, upsample=False)
    o1 = jax.block_until_ready(fwd(x1, p1, upsample=False))
    assert o1.shape == (2, 4, 16, 16)
    check(o1, residual_block_decoder_ref(x1, p1, upsample=False))

    # 2) upsampling block (ConvTranspose path), 4 -> 8 channels, 8x8 -> 16x16
    x2 = jax.random.normal(kx2, (2, 4, 8, 8), jnp.float32)
    p2 = make_params(kp2, cin=4, cout=8, upsample=True)
    o2 = jax.block_until_ready(fwd(x2, p2, upsample=True))
    assert o2.shape == (2, 8, 16, 16)
    check(o2, residual_block_decoder_ref(x2, p2, upsample=True))

    # 3) wider block exercising the 2-way Cout grid split (v7x TC parallelism)
    x3 = jax.random.normal(kx3, (2, 16, 16, 16), jnp.float32)
    p3 = make_params(kp3, cin=16, cout=16, upsample=False)
    o3 = jax.block_until_ready(fwd(x3, p3, upsample=False))
    assert o3.shape == (2, 16, 16, 16)
    check(o3, residual_block_decoder_ref(x3, p3, upsample=False))

    # 4) upsampling block exercising the Cout split in the deconv kernel
    x4 = jax.random.normal(kx4, (2, 8, 8, 8), jnp.float32)
    p4 = make_params(kp4, cin=8, cout=16, upsample=True)
    o4 = jax.block_until_ready(fwd(x4, p4, upsample=True))
    assert o4.shape == (2, 16, 16, 16)
    check(o4, residual_block_decoder_ref(x4, p4, upsample=True))

    print("KERNEL_OK")
</pallas_src>

<mosaic_0001>
module attributes {stable_mosaic.version = 11 : i64} {
  func.func @kernel(%arg0: i32, %arg1: memref<2x4x640xbf16, #tpu.memory_space<vmem>>, %arg2: memref<4x36xbf16, #tpu.memory_space<vmem>>, %arg3: memref<4x1xf32, #tpu.memory_space<vmem>>, %arg4: memref<1x512xf32, #tpu.memory_space<vmem>>, %arg5: memref<2x4x512xbf16, #tpu.memory_space<vmem>>, %arg6: memref<36x1024xbf16, #tpu.memory_space<vmem>>) attributes {dimension_semantics = [#tpu.dimension_semantics<parallel>], iteration_bounds = array<i64: 1>, scalar_prefetch = 0 : i64, scratch_operands = 1 : i64, tpu.core_type = #tpu.core_type<tc>, window_params = [{pipeline_mode = #tpu.pipeline_mode<synchronous>, transform_indices = @transform_0, window_bounds = array<i64: 2, 4, 640>}, {transform_indices = @transform_1, window_bounds = array<i64: 4, 36>}, {transform_indices = @transform_2, window_bounds = array<i64: 4, 1>}, {pipeline_mode = #tpu.pipeline_mode<synchronous>, transform_indices = @transform_3, window_bounds = array<i64: 1, 512>}, {transform_indices = @transform_4, window_bounds = array<i64: 2, 4, 512>}]} {
    %c0 = arith.constant 0 : index
    %c0_0 = arith.constant 0 : index
    %c0_1 = arith.constant 0 : index
    %0 = vector.load %arg1[%c0, %c0_0, %c0_1] : memref<2x4x640xbf16, #tpu.memory_space<vmem>>, vector<1x4x512xbf16>
    %1 = vector.shape_cast %0 : vector<1x4x512xbf16> to vector<4x512xbf16>
    %c0_2 = arith.constant 0 : index
    %c0_3 = arith.constant 0 : index
    %2 = vector.load %arg6[%c0_2, %c0_3] : memref<36x1024xbf16, #tpu.memory_space<vmem>>, vector<4x512xbf16>
    tpu.vector_store %arg6[%c0_2, %c0_3], %1 {strides = array<i32>} : memref<36x1024xbf16, #tpu.memory_space<vmem>>, vector<4x512xbf16>,
    %c0_4 = arith.constant 0 : index
    %c0_5 = arith.constant 0 : index
    %c1 = arith.constant 1 : index
    %3 = vector.load %arg1[%c0_4, %c0_5, %c1] : memref<2x4x640xbf16, #tpu.memory_space<vmem>>, vector<1x4x512xbf16>
    %4 = vector.shape_cast %3 : vector<1x4x512xbf16> to vector<4x512xbf16>
    %c4 = arith.constant 4 : index
    %c0_6 = arith.constant 0 : index
    %5 = vector.load %arg6[%c4, %c0_6] : memref<36x1024xbf16, #tpu.memory_space<vmem>>, vector<4x512xbf16>
    tpu.vector_store %arg6[%c4, %c0_6], %4 {strides = array<i32>} : memref<36x1024xbf16, #tpu.memory_space<vmem>>, vector<4x512xbf16>,
    %c0_7 = arith.constant 0 : index
    %c0_8 = arith.constant 0 : index
    %c2 = arith.constant 2 : index
    %6 = vector.load %arg1[%c0_7, %c0_8, %c2] : memref<2x4x640xbf16, #tpu.memory_space<vmem>>, vector<1x4x512xbf16>
    %7 = vector.shape_cast %6 : vector<1x4x512xbf16> to vector<4x512xbf16>
    %c8 = arith.constant 8 : index
    %c0_9 = arith.constant 0 : index
    %8 = vector.load %arg6[%c8, %c0_9] : memref<36x1024xbf16, #tpu.memory_space<vmem>>, vector<4x512xbf16>
    tpu.vector_store %arg6[%c8, %c0_9], %7 {strides = array<i32>} : memref<36x1024xbf16, #tpu.memory_space<vmem>>, vector<4x512xbf16>,
    %c0_10 = arith.constant 0 : index
    %c0_11 = arith.constant 0 : index
    %c18 = arith.constant 18 : index
    %9 = vector.load %arg1[%c0_10, %c0_11, %c18] : memref<2x4x640xbf16, #tpu.memory_space<vmem>>, vector<1x4x512xbf16>
    %10 = vector.shape_cast %9 : vector<1x4x512xbf16> to vector<4x512xbf16>
    %c12 = arith.constant 12 : index
    %c0_12 = arith.constant 0 : index
    %11 = vector.load %arg6[%c12, %c0_12] : memref<36x1024xbf16, #tpu.memory_space<vmem>>, vector<4x512xbf16>
    tpu.vector_store %arg6[%c12, %c0_12], %10 {strides = array<i32>} : memref<36x1024xbf16, #tpu.memory_space<vmem>>, vector<4x512xbf16>,
    %c0_13 = arith.constant 0 : index
    %c0_14 = arith.constant 0 : index
    %c19 = arith.constant 19 : index
    %12 = vector.load %arg1[%c0_13, %c0_14, %c19] : memref<2x4x640xbf16, #tpu.memory_space<vmem>>, vector<1x4x512xbf16>
    %13 = vector.shape_cast %12 : vector<1x4x512xbf16> to vector<4x512xbf16>
    %c16 = arith.constant 16 : index
    %c0_15 = arith.constant 0 : index
    %14 = vector.load %arg6[%c16, %c0_15] : memref<36x1024xbf16, #tpu.memory_space<vmem>>, vector<4x512xbf16>
    tpu.vector_store %arg6[%c16, %c0_15], %13 {strides = array<i32>} : memref<36x1024xbf16, #tpu.memory_space<vmem>>, vector<4x512xbf16>,
    %c0_16 = arith.constant 0 : index
    %c0_17 = arith.constant 0 : index
    %c20 = arith.constant 20 : index
    %15 = vector.load %arg1[%c0_16, %c0_17, %c20] : memref<2x4x640xbf16, #tpu.memory_space<vmem>>, vector<1x4x512xbf16>
    %16 = vector.shape_cast %15 : vector<1x4x512xbf16> to vector<4x512xbf16>
    %c20_18 = arith.constant 20 : index
    %c0_19 = arith.constant 0 : index
    %17 = vector.load %arg6[%c20_18, %c0_19] : memref<36x1024xbf16, #tpu.memory_space<vmem>>, vector<4x512xbf16>
    tpu.vector_store %arg6[%c20_18, %c0_19], %16 {strides = array<i32>} : memref<36x1024xbf16, #tpu.memory_space<vmem>>, vector<4x512xbf16>,
    %c0_20 = arith.constant 0 : index
    %c0_21 = arith.constant 0 : index
    %c36 = arith.constant 36 : index
    %18 = vector.load %arg1[%c0_20, %c0_21, %c36] : memref<2x4x640xbf16, #tpu.memory_space<vmem>>, vector<1x4x512xbf16>
    %19 = vector.shape_cast %18 : vector<1x4x512xbf16> to vector<4x512xbf16>
    %c24 = arith.constant 24 : index
    %c0_22 = arith.constant 0 : index
    %20 = vector.load %arg6[%c24, %c0_22] : memref<36x1024xbf16, #tpu.memory_space<vmem>>, vector<4x512xbf16>
    tpu.vector_store %arg6[%c24, %c0_22], %19 {strides = array<i32>} : memref<36x1024xbf16, #tpu.memory_space<vmem>>, vector<4x512xbf16>,
    %c0_23 = arith.constant 0 : index
    %c0_24 = arith.constant 0 : index
    %c37 = arith.constant 37 : index
    %21 = vector.load %arg1[%c0_23, %c0_24, %c37] : memref<2x4x640xbf16, #tpu.memory_space<vmem>>, vector<1x4x512xbf16>
    %22 = vector.shape_cast %21 : vector<1x4x512xbf16> to vector<4x512xbf16>
    %c28 = arith.constant 28 : index
    %c0_25 = arith.constant 0 : index
    %23 = vector.load %arg6[%c28, %c0_25] : memref<36x1024xbf16, #tpu.memory_space<vmem>>, vector<4x512xbf16>
    tpu.vector_store %arg6[%c28, %c0_25], %22 {strides = array<i32>} : memref<36x1024xbf16, #tpu.memory_space<vmem>>, vector<4x512xbf16>,
    %c0_26 = arith.constant 0 : index
    %c0_27 = arith.constant 0 : index
    %c38 = arith.constant 38 : index
    %24 = vector.load %arg1[%c0_26, %c0_27, %c38] : memref<2x4x640xbf16, #tpu.memory_space<vmem>>, vector<1x4x512xbf16>
    %25 = vector.shape_cast %24 : vector<1x4x512xbf16> to vector<4x512xbf16>
    %c32 = arith.constant 32 : index
    %c0_28 = arith.constant 0 : index
    %26 = vector.load %arg6[%c32, %c0_28] : memref<36x1024xbf16, #tpu.memory_space<vmem>>, vector<4x512xbf16>
    tpu.vector_store %arg6[%c32, %c0_28], %25 {strides = array<i32>} : memref<36x1024xbf16, #tpu.memory_space<vmem>>, vector<4x512xbf16>,
    %c1_29 = arith.constant 1 : index
    %c0_30 = arith.constant 0 : index
    %c0_31 = arith.constant 0 : index
    %27 = vector.load %arg1[%c1_29, %c0_30, %c0_31] : memref<2x4x640xbf16, #tpu.memory_space<vmem>>, vector<1x4x512xbf16>
    %28 = vector.shape_cast %27 : vector<1x4x512xbf16> to vector<4x512xbf16>
    %c0_32 = arith.constant 0 : index
    %c512 = arith.constant 512 : index
    %29 = vector.load %arg6[%c0_32, %c512] : memref<36x1024xbf16, #tpu.memory_space<vmem>>, vector<4x512xbf16>
    tpu.vector_store %arg6[%c0_32, %c512], %28 {strides = array<i32>} : memref<36x1024xbf16, #tpu.memory_space<vmem>>, vector<4x512xbf16>,
    %c1_33 = arith.constant 1 : index
    %c0_34 = arith.constant 0 : index
    %c1_35 = arith.constant 1 : index
    %30 = vector.load %arg1[%c1_33, %c0_34, %c1_35] : memref<2x4x640xbf16, #tpu.memory_space<vmem>>, vector<1x4x512xbf16>
    %31 = vector.shape_cast %30 : vector<1x4x512xbf16> to vector<4x512xbf16>
    %c4_36 = arith.constant 4 : index
    %c512_37 = arith.constant 512 : index
    %32 = vector.load %arg6[%c4_36, %c512_37] : memref<36x1024xbf16, #tpu.memory_space<vmem>>, vector<4x512xbf16>
    tpu.vector_store %arg6[%c4_36, %c512_37], %31 {strides = array<i32>} : memref<36x1024xbf16, #tpu.memory_space<vmem>>, vector<4x512xbf16>,
    %c1_38 = arith.constant 1 : index
    %c0_39 = arith.constant 0 : index
    %c2_40 = arith.constant 2 : index
    %33 = vector.load %arg1[%c1_38, %c0_39, %c2_40] : memref<2x4x640xbf16, #tpu.memory_space<vmem>>, vector<1x4x512xbf16>
    %34 = vector.shape_cast %33 : vector<1x4x512xbf16> to vector<4x512xbf16>
    %c8_41 = arith.constant 8 : index
    %c512_42 = arith.constant 512 : index
    %35 = vector.load %arg6[%c8_41, %c512_42] : memref<36x1024xbf16, #tpu.memory_space<vmem>>, vector<4x512xbf16>
    tpu.vector_store %arg6[%c8_41, %c512_42], %34 {strides = array<i32>} : memref<36x1024xbf16, #tpu.memory_space<vmem>>, vector<4x512xbf16>,
    %c1_43 = arith.constant 1 : index
    %c0_44 = arith.constant 0 : index
    %c18_45 = arith.constant 18 : index
    %36 = vector.load %arg1[%c1_43, %c0_44, %c18_45] : memref<2x4x640xbf16, #tpu.memory_space<vmem>>, vector<1x4x512xbf16>
    %37 = vector.shape_cast %36 : vector<1x4x512xbf16> to vector<4x512xbf16>
    %c12_46 = arith.constant 12 : index
    %c512_47 = arith.constant 512 : index
    %38 = vector.load %arg6[%c12_46, %c512_47] : memref<36x1024xbf16, #tpu.memory_space<vmem>>, vector<4x512xbf16>
    tpu.vector_store %arg6[%c12_46, %c512_47], %37 {strides = array<i32>} : memref<36x1024xbf16, #tpu.memory_space<vmem>>, vector<4x512xbf16>,
    %c1_48 = arith.constant 1 : index
    %c0_49 = arith.constant 0 : index
    %c19_50 = arith.constant 19 : index
    %39 = vector.load %arg1[%c1_48, %c0_49, %c19_50] : memref<2x4x640xbf16, #tpu.memory_space<vmem>>, vector<1x4x512xbf16>
    %40 = vector.shape_cast %39 : vector<1x4x512xbf16> to vector<4x512xbf16>
    %c16_51 = arith.constant 16 : index
    %c512_52 = arith.constant 512 : index
    %41 = vector.load %arg6[%c16_51, %c512_52] : memref<36x1024xbf16, #tpu.memory_space<vmem>>, vector<4x512xbf16>
    tpu.vector_store %arg6[%c16_51, %c512_52], %40 {strides = array<i32>} : memref<36x1024xbf16, #tpu.memory_space<vmem>>, vector<4x512xbf16>,
    %c1_53 = arith.constant 1 : index
    %c0_54 = arith.constant 0 : index
    %c20_55 = arith.constant 20 : index
    %42 = vector.load %arg1[%c1_53, %c0_54, %c20_55] : memref<2x4x640xbf16, #tpu.memory_space<vmem>>, vector<1x4x512xbf16>
    %43 = vector.shape_cast %42 : vector<1x4x512xbf16> to vector<4x512xbf16>
    %c20_56 = arith.constant 20 : index
    %c512_57 = arith.constant 512 : index
    %44 = vector.load %arg6[%c20_56, %c512_57] : memref<36x1024xbf16, #tpu.memory_space<vmem>>, vector<4x512xbf16>
    tpu.vector_store %arg6[%c20_56, %c512_57], %43 {strides = array<i32>} : memref<36x1024xbf16, #tpu.memory_space<vmem>>, vector<4x512xbf16>,
    %c1_58 = arith.constant 1 : index
    %c0_59 = arith.constant 0 : index
    %c36_60 = arith.constant 36 : index
    %45 = vector.load %arg1[%c1_58, %c0_59, %c36_60] : memref<2x4x640xbf16, #tpu.memory_space<vmem>>, vector<1x4x512xbf16>
    %46 = vector.shape_cast %45 : vector<1x4x512xbf16> to vector<4x512xbf16>
    %c24_61 = arith.constant 24 : index
    %c512_62 = arith.constant 512 : index
    %47 = vector.load %arg6[%c24_61, %c512_62] : memref<36x1024xbf16, #tpu.memory_space<vmem>>, vector<4x512xbf16>
    tpu.vector_store %arg6[%c24_61, %c512_62], %46 {strides = array<i32>} : memref<36x1024xbf16, #tpu.memory_space<vmem>>, vector<4x512xbf16>,
    %c1_63 = arith.constant 1 : index
    %c0_64 = arith.constant 0 : index
    %c37_65 = arith.constant 37 : index
    %48 = vector.load %arg1[%c1_63, %c0_64, %c37_65] : memref<2x4x640xbf16, #tpu.memory_space<vmem>>, vector<1x4x512xbf16>
    %49 = vector.shape_cast %48 : vector<1x4x512xbf16> to vector<4x512xbf16>
    %c28_66 = arith.constant 28 : index
    %c512_67 = arith.constant 512 : index
    %50 = vector.load %arg6[%c28_66, %c512_67] : memref<36x1024xbf16, #tpu.memory_space<vmem>>, vector<4x512xbf16>
    tpu.vector_store %arg6[%c28_66, %c512_67], %49 {strides = array<i32>} : memref<36x1024xbf16, #tpu.memory_space<vmem>>, vector<4x512xbf16>,
    %c1_68 = arith.constant 1 : index
    %c0_69 = arith.constant 0 : index
    %c38_70 = arith.constant 38 : index
    %51 = vector.load %arg1[%c1_68, %c0_69, %c38_70] : memref<2x4x640xbf16, #tpu.memory_space<vmem>>, vector<1x4x512xbf16>
    %52 = vector.shape_cast %51 : vector<1x4x512xbf16> to vector<4x512xbf16>
    %c32_71 = arith.constant 32 : index
    %c512_72 = arith.constant 512 : index
    %53 = vector.load %arg6[%c32_71, %c512_72] : memref<36x1024xbf16, #tpu.memory_space<vmem>>, vector<4x512xbf16>
    tpu.vector_store %arg6[%c32_71, %c512_72], %52 {strides = array<i32>} : memref<36x1024xbf16, #tpu.memory_space<vmem>>, vector<4x512xbf16>,
    %c0_73 = arith.constant 0 : index
    %c0_74 = arith.constant 0 : index
    %54 = vector.load %arg2[%c0_73, %c0_74] : memref<4x36xbf16, #tpu.memory_space<vmem>>, vector<4x36xbf16>
    %c0_75 = arith.constant 0 : index
    %c0_76 = arith.constant 0 : index
    %55 = vector.load %arg6[%c0_75, %c0_76] : memref<36x1024xbf16, #tpu.memory_space<vmem>>, vector<36x1024xbf16>
    %cst = arith.constant dense<0.000000e+00> : vector<4x1024xf32>
    %56 = tpu.matmul %54, %55, %cst {dimension_numbers = #tpu.dot_dimension_numbers<[1], [0], [0], [1], [0, 0, 1, 1], [], []>} : vector<4x36xbf16>, vector<36x1024xbf16>, vector<4x1024xf32> -> vector<4x1024xf32>
    %c0_77 = arith.constant 0 : index
    %c0_78 = arith.constant 0 : index
    %57 = vector.load %arg3[%c0_77, %c0_78] : memref<4x1xf32, #tpu.memory_space<vmem>>, vector<4x1xf32>
    %58 = vector.broadcast %57 : vector<4x1xf32> to vector<4x1024xf32>
    %59 = arith.addf %56, %58 : vector<4x1024xf32>
    %cst_79 = arith.constant 0.000000e+00 : f32
    %60 = vector.broadcast %cst_79 : f32 to vector<4x1024xf32>
    %61 = arith.cmpf ogt, %59, %60 : vector<4x1024xf32>
    %cst_80 = arith.constant 2.000000e-01 : f32
    %62 = vector.broadcast %cst_80 : f32 to vector<4x1024xf32>
    %63 = arith.mulf %62, %59 : vector<4x1024xf32>
    %64 = arith.select %61, %59, %63 : vector<4x1024xi1>, vector<4x1024xf32>
    %65 = vector.extract_strided_slice %64 {offsets = [0, 0], sizes = [4, 512], strides = [1, 1]} : vector<4x1024xf32> to vector<4x512xf32>
    %c0_81 = arith.constant 0 : index
    %c0_82 = arith.constant 0 : index
    %66 = vector.load %arg4[%c0_81, %c0_82] : memref<1x512xf32, #tpu.memory_space<vmem>>, vector<1x512xf32>
    %67 = vector.broadcast %66 : vector<1x512xf32> to vector<4x512xf32>
    %68 = arith.mulf %65, %67 : vector<4x512xf32>
    %69 = arith.truncf %68 : vector<4x512xf32> to vector<4x512xbf16>
    %c0_83 = arith.constant 0 : index
    %c0_84 = arith.constant 0 : index
    %c0_85 = arith.constant 0 : index
    %70 = vector.load %arg5[%c0_83, %c0_84, %c0_85] : memref<2x4x512xbf16, #tpu.memory_space<vmem>>, vector<1x4x512xbf16>
    %71 = vector.shape_cast %70 : vector<1x4x512xbf16> to vector<4x512xbf16>
    %72 = vector.shape_cast %69 : vector<4x512xbf16> to vector<1x4x512xbf16>
    tpu.vector_store %arg5[%c0_83, %c0_84, %c0_85], %72 {strides = array<i32>} : memref<2x4x512xbf16, #tpu.memory_space<vmem>>, vector<1x4x512xbf16>,
    %73 = vector.extract_strided_slice %64 {offsets = [0, 512], sizes = [4, 512], strides = [1, 1]} : vector<4x1024xf32> to vector<4x512xf32>
    %c0_86 = arith.constant 0 : index
    %c0_87 = arith.constant 0 : index
    %74 = vector.load %arg4[%c0_86, %c0_87] : memref<1x512xf32, #tpu.memory_space<vmem>>, vector<1x512xf32>
    %75 = vector.broadcast %74 : vector<1x512xf32> to vector<4x512xf32>
    %76 = arith.mulf %73, %75 : vector<4x512xf32>
    %77 = arith.truncf %76 : vector<4x512xf32> to vector<4x512xbf16>
    %c1_88 = arith.constant 1 : index
    %c0_89 = arith.constant 0 : index
    %c0_90 = arith.constant 0 : index
    %78 = vector.load %arg5[%c1_88, %c0_89, %c0_90] : memref<2x4x512xbf16, #tpu.memory_space<vmem>>, vector<1x4x512xbf16>
    %79 = vector.shape_cast %78 : vector<1x4x512xbf16> to vector<4x512xbf16>
    %80 = vector.shape_cast %77 : vector<4x512xbf16> to vector<1x4x512xbf16>
    tpu.vector_store %arg5[%c1_88, %c0_89, %c0_90], %80 {strides = array<i32>} : memref<2x4x512xbf16, #tpu.memory_space<vmem>>, vector<1x4x512xbf16>,
    return
  }
  func.func @transform_0(%arg0: i32) -> (i32, i32, i32) {
    %c0_i32 = arith.constant 0 : i32
    %c0_i32_0 = arith.constant 0 : i32
    %c0_i32_1 = arith.constant 0 : i32
    %c0_i32_2 = arith.constant 0 : i32
    return %c0_i32, %c0_i32_0, %c0_i32_1 : i32, i32, i32
  }
  func.func @transform_1(%arg0: i32) -> (i32, i32) {
    %c0_i32 = arith.constant 0 : i32
    %c0_i32_0 = arith.constant 0 : i32
    return %arg0, %c0_i32 : i32, i32
  }
  func.func @transform_2(%arg0: i32) -> (i32, i32) {
    %c0_i32 = arith.constant 0 : i32
    %c0_i32_0 = arith.constant 0 : i32
    return %arg0, %c0_i32 : i32, i32
  }
  func.func @transform_3(%arg0: i32) -> (i32, i32) {
    %c0_i32 = arith.constant 0 : i32
    %c0_i32_0 = arith.constant 0 : i32
    %c0_i32_1 = arith.constant 0 : i32
    return %c0_i32, %c0_i32_0 : i32, i32
  }
  func.func @transform_4(%arg0: i32) -> (i32, i32, i32) {
    %c0_i32 = arith.constant 0 : i32
    %c0_i32_0 = arith.constant 0 : i32
    %c0_i32_1 = arith.constant 0 : i32
    return %c0_i32, %arg0, %c0_i32_0 : i32, i32, i32
  }
}

module attributes {stable_mosaic.version = 11 : i64} {
  func.func @kernel(%arg0: i32, %arg1: memref<2x4x512xbf16, #tpu.memory_space<vmem>>, %arg2: memref<2x4x640xbf16, #tpu.memory_space<vmem>>, %arg3: memref<4x36xbf16, #tpu.memory_space<vmem>>, %arg4: memref<4x1xf32, #tpu.memory_space<vmem>>, %arg5: memref<2x4x384xbf16, #tpu.memory_space<vmem>>, %arg6: memref<36x768xbf16, #tpu.memory_space<vmem>>) attributes {dimension_semantics = [#tpu.dimension_semantics<parallel>], iteration_bounds = array<i64: 1>, scalar_prefetch = 0 : i64, scratch_operands = 1 : i64, tpu.core_type = #tpu.core_type<tc>, window_params = [{pipeline_mode = #tpu.pipeline_mode<synchronous>, transform_indices = @transform_0, window_bounds = array<i64: 2, 4, 512>}, {transform_indices = @transform_1, window_bounds = array<i64: 2, 4, 640>}, {transform_indices = @transform_2, window_bounds = array<i64: 4, 36>}, {transform_indices = @transform_3, window_bounds = array<i64: 4, 1>}, {transform_indices = @transform_4, window_bounds = array<i64: 2, 4, 384>}]} {
    %c0 = arith.constant 0 : index
    %c0_0 = arith.constant 0 : index
    %c0_1 = arith.constant 0 : index
    %0 = vector.load %arg1[%c0, %c0_0, %c0_1] : memref<2x4x512xbf16, #tpu.memory_space<vmem>>, vector<1x4x384xbf16>
    %1 = vector.shape_cast %0 : vector<1x4x384xbf16> to vector<4x384xbf16>
    %c0_2 = arith.constant 0 : index
    %c0_3 = arith.constant 0 : index
    %2 = vector.load %arg6[%c0_2, %c0_3] : memref<36x768xbf16, #tpu.memory_space<vmem>>, vector<4x384xbf16>
    tpu.vector_store %arg6[%c0_2, %c0_3], %1 {strides = array<i32>} : memref<36x768xbf16, #tpu.memory_space<vmem>>, vector<4x384xbf16>,
    %c0_4 = arith.constant 0 : index
    %c0_5 = arith.constant 0 : index
    %c1 = arith.constant 1 : index
    %3 = vector.load %arg1[%c0_4, %c0_5, %c1] : memref<2x4x512xbf16, #tpu.memory_space<vmem>>, vector<1x4x384xbf16>
    %4 = vector.shape_cast %3 : vector<1x4x384xbf16> to vector<4x384xbf16>
    %c4 = arith.constant 4 : index
    %c0_6 = arith.constant 0 : index
    %5 = vector.load %arg6[%c4, %c0_6] : memref<36x768xbf16, #tpu.memory_space<vmem>>, vector<4x384xbf16>
    tpu.vector_store %arg6[%c4, %c0_6], %4 {strides = array<i32>} : memref<36x768xbf16, #tpu.memory_space<vmem>>, vector<4x384xbf16>,
    %c0_7 = arith.constant 0 : index
    %c0_8 = arith.constant 0 : index
    %c2 = arith.constant 2 : index
    %6 = vector.load %arg1[%c0_7, %c0_8, %c2] : memref<2x4x512xbf16, #tpu.memory_space<vmem>>, vector<1x4x384xbf16>
    %7 = vector.shape_cast %6 : vector<1x4x384xbf16> to vector<4x384xbf16>
    %c8 = arith.constant 8 : index
    %c0_9 = arith.constant 0 : index
    %8 = vector.load %arg6[%c8, %c0_9] : memref<36x768xbf16, #tpu.memory_space<vmem>>, vector<4x384xbf16>
    tpu.vector_store %arg6[%c8, %c0_9], %7 {strides = array<i32>} : memref<36x768xbf16, #tpu.memory_space<vmem>>, vector<4x384xbf16>,
    %c0_10 = arith.constant 0 : index
    %c0_11 = arith.constant 0 : index
    %c18 = arith.constant 18 : index
    %9 = vector.load %arg1[%c0_10, %c0_11, %c18] : memref<2x4x512xbf16, #tpu.memory_space<vmem>>, vector<1x4x384xbf16>
    %10 = vector.shape_cast %9 : vector<1x4x384xbf16> to vector<4x384xbf16>
    %c12 = arith.constant 12 : index
    %c0_12 = arith.constant 0 : index
    %11 = vector.load %arg6[%c12, %c0_12] : memref<36x768xbf16, #tpu.memory_space<vmem>>, vector<4x384xbf16>
    tpu.vector_store %arg6[%c12, %c0_12], %10 {strides = array<i32>} : memref<36x768xbf16, #tpu.memory_space<vmem>>, vector<4x384xbf16>,
    %c0_13 = arith.constant 0 : index
    %c0_14 = arith.constant 0 : index
    %c19 = arith.constant 19 : index
    %12 = vector.load %arg1[%c0_13, %c0_14, %c19] : memref<2x4x512xbf16, #tpu.memory_space<vmem>>, vector<1x4x384xbf16>
    %13 = vector.shape_cast %12 : vector<1x4x384xbf16> to vector<4x384xbf16>
    %c16 = arith.constant 16 : index
    %c0_15 = arith.constant 0 : index
    %14 = vector.load %arg6[%c16, %c0_15] : memref<36x768xbf16, #tpu.memory_space<vmem>>, vector<4x384xbf16>
    tpu.vector_store %arg6[%c16, %c0_15], %13 {strides = array<i32>} : memref<36x768xbf16, #tpu.memory_space<vmem>>, vector<4x384xbf16>,
    %c0_16 = arith.constant 0 : index
    %c0_17 = arith.constant 0 : index
    %c20 = arith.constant 20 : index
    %15 = vector.load %arg1[%c0_16, %c0_17, %c20] : memref<2x4x512xbf16, #tpu.memory_space<vmem>>, vector<1x4x384xbf16>
    %16 = vector.shape_cast %15 : vector<1x4x384xbf16> to vector<4x384xbf16>
    %c20_18 = arith.constant 20 : index
    %c0_19 = arith.constant 0 : index
    %17 = vector.load %arg6[%c20_18, %c0_19] : memref<36x768xbf16, #tpu.memory_space<vmem>>, vector<4x384xbf16>
    tpu.vector_store %arg6[%c20_18, %c0_19], %16 {strides = array<i32>} : memref<36x768xbf16, #tpu.memory_space<vmem>>, vector<4x384xbf16>,
    %c0_20 = arith.constant 0 : index
    %c0_21 = arith.constant 0 : index
    %c36 = arith.constant 36 : index
    %18 = vector.load %arg1[%c0_20, %c0_21, %c36] : memref<2x4x512xbf16, #tpu.memory_space<vmem>>, vector<1x4x384xbf16>
    %19 = vector.shape_cast %18 : vector<1x4x384xbf16> to vector<4x384xbf16>
    %c24 = arith.constant 24 : index
    %c0_22 = arith.constant 0 : index
    %20 = vector.load %arg6[%c24, %c0_22] : memref<36x768xbf16, #tpu.memory_space<vmem>>, vector<4x384xbf16>
    tpu.vector_store %arg6[%c24, %c0_22], %19 {strides = array<i32>} : memref<36x768xbf16, #tpu.memory_space<vmem>>, vector<4x384xbf16>,
    %c0_23 = arith.constant 0 : index
    %c0_24 = arith.constant 0 : index
    %c37 = arith.constant 37 : index
    %21 = vector.load %arg1[%c0_23, %c0_24, %c37] : memref<2x4x512xbf16, #tpu.memory_space<vmem>>, vector<1x4x384xbf16>
    %22 = vector.shape_cast %21 : vector<1x4x384xbf16> to vector<4x384xbf16>
    %c28 = arith.constant 28 : index
    %c0_25 = arith.constant 0 : index
    %23 = vector.load %arg6[%c28, %c0_25] : memref<36x768xbf16, #tpu.memory_space<vmem>>, vector<4x384xbf16>
    tpu.vector_store %arg6[%c28, %c0_25], %22 {strides = array<i32>} : memref<36x768xbf16, #tpu.memory_space<vmem>>, vector<4x384xbf16>,
    %c0_26 = arith.constant 0 : index
    %c0_27 = arith.constant 0 : index
    %c38 = arith.constant 38 : index
    %24 = vector.load %arg1[%c0_26, %c0_27, %c38] : memref<2x4x512xbf16, #tpu.memory_space<vmem>>, vector<1x4x384xbf16>
    %25 = vector.shape_cast %24 : vector<1x4x384xbf16> to vector<4x384xbf16>
    %c32 = arith.constant 32 : index
    %c0_28 = arith.constant 0 : index
    %26 = vector.load %arg6[%c32, %c0_28] : memref<36x768xbf16, #tpu.memory_space<vmem>>, vector<4x384xbf16>
    tpu.vector_store %arg6[%c32, %c0_28], %25 {strides = array<i32>} : memref<36x768xbf16, #tpu.memory_space<vmem>>, vector<4x384xbf16>,
    %c1_29 = arith.constant 1 : index
    %c0_30 = arith.constant 0 : index
    %c0_31 = arith.constant 0 : index
    %27 = vector.load %arg1[%c1_29, %c0_30, %c0_31] : memref<2x4x512xbf16, #tpu.memory_space<vmem>>, vector<1x4x384xbf16>
    %28 = vector.shape_cast %27 : vector<1x4x384xbf16> to vector<4x384xbf16>
    %c0_32 = arith.constant 0 : index
    %c384 = arith.constant 384 : index
    %29 = vector.load %arg6[%c0_32, %c384] : memref<36x768xbf16, #tpu.memory_space<vmem>>, vector<4x384xbf16>
    tpu.vector_store %arg6[%c0_32, %c384], %28 {strides = array<i32>} : memref<36x768xbf16, #tpu.memory_space<vmem>>, vector<4x384xbf16>,
    %c1_33 = arith.constant 1 : index
    %c0_34 = arith.constant 0 : index
    %c1_35 = arith.constant 1 : index
    %30 = vector.load %arg1[%c1_33, %c0_34, %c1_35] : memref<2x4x512xbf16, #tpu.memory_space<vmem>>, vector<1x4x384xbf16>
    %31 = vector.shape_cast %30 : vector<1x4x384xbf16> to vector<4x384xbf16>
    %c4_36 = arith.constant 4 : index
    %c384_37 = arith.constant 384 : index
    %32 = vector.load %arg6[%c4_36, %c384_37] : memref<36x768xbf16, #tpu.memory_space<vmem>>, vector<4x384xbf16>
    tpu.vector_store %arg6[%c4_36, %c384_37], %31 {strides = array<i32>} : memref<36x768xbf16, #tpu.memory_space<vmem>>, vector<4x384xbf16>,
    %c1_38 = arith.constant 1 : index
    %c0_39 = arith.constant 0 : index
    %c2_40 = arith.constant 2 : index
    %33 = vector.load %arg1[%c1_38, %c0_39, %c2_40] : memref<2x4x512xbf16, #tpu.memory_space<vmem>>, vector<1x4x384xbf16>
    %34 = vector.shape_cast %33 : vector<1x4x384xbf16> to vector<4x384xbf16>
    %c8_41 = arith.constant 8 : index
    %c384_42 = arith.constant 384 : index
    %35 = vector.load %arg6[%c8_41, %c384_42] : memref<36x768xbf16, #tpu.memory_space<vmem>>, vector<4x384xbf16>
    tpu.vector_store %arg6[%c8_41, %c384_42], %34 {strides = array<i32>} : memref<36x768xbf16, #tpu.memory_space<vmem>>, vector<4x384xbf16>,
    %c1_43 = arith.constant 1 : index
    %c0_44 = arith.constant 0 : index
    %c18_45 = arith.constant 18 : index
    %36 = vector.load %arg1[%c1_43, %c0_44, %c18_45] : memref<2x4x512xbf16, #tpu.memory_space<vmem>>, vector<1x4x384xbf16>
    %37 = vector.shape_cast %36 : vector<1x4x384xbf16> to vector<4x384xbf16>
    %c12_46 = arith.constant 12 : index
    %c384_47 = arith.constant 384 : index
    %38 = vector.load %arg6[%c12_46, %c384_47] : memref<36x768xbf16, #tpu.memory_space<vmem>>, vector<4x384xbf16>
    tpu.vector_store %arg6[%c12_46, %c384_47], %37 {strides = array<i32>} : memref<36x768xbf16, #tpu.memory_space<vmem>>, vector<4x384xbf16>,
    %c1_48 = arith.constant 1 : index
    %c0_49 = arith.constant 0 : index
    %c19_50 = arith.constant 19 : index
    %39 = vector.load %arg1[%c1_48, %c0_49, %c19_50] : memref<2x4x512xbf16, #tpu.memory_space<vmem>>, vector<1x4x384xbf16>
    %40 = vector.shape_cast %39 : vector<1x4x384xbf16> to vector<4x384xbf16>
    %c16_51 = arith.constant 16 : index
    %c384_52 = arith.constant 384 : index
    %41 = vector.load %arg6[%c16_51, %c384_52] : memref<36x768xbf16, #tpu.memory_space<vmem>>, vector<4x384xbf16>
    tpu.vector_store %arg6[%c16_51, %c384_52], %40 {strides = array<i32>} : memref<36x768xbf16, #tpu.memory_space<vmem>>, vector<4x384xbf16>,
    %c1_53 = arith.constant 1 : index
    %c0_54 = arith.constant 0 : index
    %c20_55 = arith.constant 20 : index
    %42 = vector.load %arg1[%c1_53, %c0_54, %c20_55] : memref<2x4x512xbf16, #tpu.memory_space<vmem>>, vector<1x4x384xbf16>
    %43 = vector.shape_cast %42 : vector<1x4x384xbf16> to vector<4x384xbf16>
    %c20_56 = arith.constant 20 : index
    %c384_57 = arith.constant 384 : index
    %44 = vector.load %arg6[%c20_56, %c384_57] : memref<36x768xbf16, #tpu.memory_space<vmem>>, vector<4x384xbf16>
    tpu.vector_store %arg6[%c20_56, %c384_57], %43 {strides = array<i32>} : memref<36x768xbf16, #tpu.memory_space<vmem>>, vector<4x384xbf16>,
    %c1_58 = arith.constant 1 : index
    %c0_59 = arith.constant 0 : index
    %c36_60 = arith.constant 36 : index
    %45 = vector.load %arg1[%c1_58, %c0_59, %c36_60] : memref<2x4x512xbf16, #tpu.memory_space<vmem>>, vector<1x4x384xbf16>
    %46 = vector.shape_cast %45 : vector<1x4x384xbf16> to vector<4x384xbf16>
    %c24_61 = arith.constant 24 : index
    %c384_62 = arith.constant 384 : index
    %47 = vector.load %arg6[%c24_61, %c384_62] : memref<36x768xbf16, #tpu.memory_space<vmem>>, vector<4x384xbf16>
    tpu.vector_store %arg6[%c24_61, %c384_62], %46 {strides = array<i32>} : memref<36x768xbf16, #tpu.memory_space<vmem>>, vector<4x384xbf16>,
    %c1_63 = arith.constant 1 : index
    %c0_64 = arith.constant 0 : index
    %c37_65 = arith.constant 37 : index
    %48 = vector.load %arg1[%c1_63, %c0_64, %c37_65] : memref<2x4x512xbf16, #tpu.memory_space<vmem>>, vector<1x4x384xbf16>
    %49 = vector.shape_cast %48 : vector<1x4x384xbf16> to vector<4x384xbf16>
    %c28_66 = arith.constant 28 : index
    %c384_67 = arith.constant 384 : index
    %50 = vector.load %arg6[%c28_66, %c384_67] : memref<36x768xbf16, #tpu.memory_space<vmem>>, vector<4x384xbf16>
    tpu.vector_store %arg6[%c28_66, %c384_67], %49 {strides = array<i32>} : memref<36x768xbf16, #tpu.memory_space<vmem>>, vector<4x384xbf16>,
    %c1_68 = arith.constant 1 : index
    %c0_69 = arith.constant 0 : index
    %c38_70 = arith.constant 38 : index
    %51 = vector.load %arg1[%c1_68, %c0_69, %c38_70] : memref<2x4x512xbf16, #tpu.memory_space<vmem>>, vector<1x4x384xbf16>
    %52 = vector.shape_cast %51 : vector<1x4x384xbf16> to vector<4x384xbf16>
    %c32_71 = arith.constant 32 : index
    %c384_72 = arith.constant 384 : index
    %53 = vector.load %arg6[%c32_71, %c384_72] : memref<36x768xbf16, #tpu.memory_space<vmem>>, vector<4x384xbf16>
    tpu.vector_store %arg6[%c32_71, %c384_72], %52 {strides = array<i32>} : memref<36x768xbf16, #tpu.memory_space<vmem>>, vector<4x384xbf16>,
    %c0_73 = arith.constant 0 : index
    %c0_74 = arith.constant 0 : index
    %54 = vector.load %arg3[%c0_73, %c0_74] : memref<4x36xbf16, #tpu.memory_space<vmem>>, vector<4x36xbf16>
    %c0_75 = arith.constant 0 : index
    %c0_76 = arith.constant 0 : index
    %55 = vector.load %arg6[%c0_75, %c0_76] : memref<36x768xbf16, #tpu.memory_space<vmem>>, vector<36x768xbf16>
    %cst = arith.constant dense<0.000000e+00> : vector<4x768xf32>
    %56 = tpu.matmul %54, %55, %cst {dimension_numbers = #tpu.dot_dimension_numbers<[1], [0], [0], [1], [0, 0, 1, 1], [], []>} : vector<4x36xbf16>, vector<36x768xbf16>, vector<4x768xf32> -> vector<4x768xf32>
    %c0_77 = arith.constant 0 : index
    %c0_78 = arith.constant 0 : index
    %57 = vector.load %arg4[%c0_77, %c0_78] : memref<4x1xf32, #tpu.memory_space<vmem>>, vector<4x1xf32>
    %58 = vector.broadcast %57 : vector<4x1xf32> to vector<4x768xf32>
    %59 = arith.addf %56, %58 : vector<4x768xf32>
    %60 = vector.extract_strided_slice %59 {offsets = [0, 0], sizes = [4, 384], strides = [1, 1]} : vector<4x768xf32> to vector<4x384xf32>
    %c0_79 = arith.constant 0 : index
    %c0_80 = arith.constant 0 : index
    %c38_81 = arith.constant 38 : index
    %61 = vector.load %arg2[%c0_79, %c0_80, %c38_81] : memref<2x4x640xbf16, #tpu.memory_space<vmem>>, vector<1x4x384xbf16>
    %62 = vector.shape_cast %61 : vector<1x4x384xbf16> to vector<4x384xbf16>
    %63 = arith.extf %62 : vector<4x384xbf16> to vector<4x384xf32>
    %64 = arith.addf %60, %63 : vector<4x384xf32>
    %cst_82 = arith.constant 0.000000e+00 : f32
    %65 = vector.broadcast %cst_82 : f32 to vector<4x384xf32>
    %66 = arith.cmpf ogt, %64, %65 : vector<4x384xf32>
    %cst_83 = arith.constant 2.000000e-01 : f32
    %67 = vector.broadcast %cst_83 : f32 to vector<4x384xf32>
    %68 = arith.mulf %67, %64 : vector<4x384xf32>
    %69 = arith.select %66, %64, %68 : vector<4x384xi1>, vector<4x384xf32>
    %70 = arith.truncf %69 : vector<4x384xf32> to vector<4x384xbf16>
    %c0_84 = arith.constant 0 : index
    %c0_85 = arith.constant 0 : index
    %c0_86 = arith.constant 0 : index
    %71 = vector.load %arg5[%c0_84, %c0_85, %c0_86] : memref<2x4x384xbf16, #tpu.memory_space<vmem>>, vector<1x4x384xbf16>
    %72 = vector.shape_cast %71 : vector<1x4x384xbf16> to vector<4x384xbf16>
    %73 = vector.shape_cast %70 : vector<4x384xbf16> to vector<1x4x384xbf16>
    tpu.vector_store %arg5[%c0_84, %c0_85, %c0_86], %73 {strides = array<i32>} : memref<2x4x384xbf16, #tpu.memory_space<vmem>>, vector<1x4x384xbf16>,
    %74 = vector.extract_strided_slice %59 {offsets = [0, 384], sizes = [4, 384], strides = [1, 1]} : vector<4x768xf32> to vector<4x384xf32>
    %c1_87 = arith.constant 1 : index
    %c0_88 = arith.constant 0 : index
    %c38_89 = arith.constant 38 : index
    %75 = vector.load %arg2[%c1_87, %c0_88, %c38_89] : memref<2x4x640xbf16, #tpu.memory_space<vmem>>, vector<1x4x384xbf16>
    %76 = vector.shape_cast %75 : vector<1x4x384xbf16> to vector<4x384xbf16>
    %77 = arith.extf %76 : vector<4x384xbf16> to vector<4x384xf32>
    %78 = arith.addf %74, %77 : vector<4x384xf32>
    %cst_90 = arith.constant 0.000000e+00 : f32
    %79 = vector.broadcast %cst_90 : f32 to vector<4x384xf32>
    %80 = arith.cmpf ogt, %78, %79 : vector<4x384xf32>
    %cst_91 = arith.constant 2.000000e-01 : f32
    %81 = vector.broadcast %cst_91 : f32 to vector<4x384xf32>
    %82 = arith.mulf %81, %78 : vector<4x384xf32>
    %83 = arith.select %80, %78, %82 : vector<4x384xi1>, vector<4x384xf32>
    %84 = arith.truncf %83 : vector<4x384xf32> to vector<4x384xbf16>
    %c1_92 = arith.constant 1 : index
    %c0_93 = arith.constant 0 : index
    %c0_94 = arith.constant 0 : index
    %85 = vector.load %arg5[%c1_92, %c0_93, %c0_94] : memref<2x4x384xbf16, #tpu.memory_space<vmem>>, vector<1x4x384xbf16>
    %86 = vector.shape_cast %85 : vector<1x4x384xbf16> to vector<4x384xbf16>
    %87 = vector.shape_cast %84 : vector<4x384xbf16> to vector<1x4x384xbf16>
    tpu.vector_store %arg5[%c1_92, %c0_93, %c0_94], %87 {strides = array<i32>} : memref<2x4x384xbf16, #tpu.memory_space<vmem>>, vector<1x4x384xbf16>,
    return
  }
  func.func @transform_0(%arg0: i32) -> (i32, i32, i32) {
    %c0_i32 = arith.constant 0 : i32
    %c0_i32_0 = arith.constant 0 : i32
    %c0_i32_1 = arith.constant 0 : i32
    %c0_i32_2 = arith.constant 0 : i32
    return %c0_i32, %c0_i32_0, %c0_i32_1 : i32, i32, i32
  }
  func.func @transform_1(%arg0: i32) -> (i32, i32, i32) {
    %c0_i32 = arith.constant 0 : i32
    %c0_i32_0 = arith.constant 0 : i32
    %c0_i32_1 = arith.constant 0 : i32
    return %c0_i32, %arg0, %c0_i32_0 : i32, i32, i32
  }
  func.func @transform_2(%arg0: i32) -> (i32, i32) {
    %c0_i32 = arith.constant 0 : i32
    %c0_i32_0 = arith.constant 0 : i32
    return %arg0, %c0_i32 : i32, i32
  }
  func.func @transform_3(%arg0: i32) -> (i32, i32) {
    %c0_i32 = arith.constant 0 : i32
    %c0_i32_0 = arith.constant 0 : i32
    return %arg0, %c0_i32 : i32, i32
  }
  func.func @transform_4(%arg0: i32) -> (i32, i32, i32) {
    %c0_i32 = arith.constant 0 : i32
    %c0_i32_0 = arith.constant 0 : i32
    %c0_i32_1 = arith.constant 0 : i32
    return %c0_i32, %arg0, %c0_i32_0 : i32, i32, i32
  }
}

</mosaic_0001>

<bundles_post_ra>
// kernel: residual_block_decoder.3
= control target key start
LH: loop header
LB: loop body
LE: loop exit
PB: predicated region body
PF: predicated region fallthrough
CT: control target
= control target key end

     0   :  { %v45_v0 = vlaneseq  ;;  %v1015_v1 = vmov 1983009808   ;;  %s1016_s19 = smov 126   ;;  %s1017_s20 = smov 127   ;;  %v1024_v22 = vmov 0   ;;  %vm62_vm0 = vcmask 1043456   ;;  %s1196_s0 = inlined_call_operand.vmem [shape: bf16[2,4,512], index: 0, kind: input, shape index: {}]   ;;  %s1197_s3 = inlined_call_operand.vmem [shape: f32[4,1], index: 3, kind: input, shape index: {}]   ;;  %s1198_s1 = inlined_call_operand.vmem [shape: bf16[2,4,640], index: 1, kind: input, shape index: {}]   ;;  %s1199_s2 = inlined_call_operand.vmem [shape: bf16[4,36], index: 2, kind: input, shape index: {}]   ;;  %s1200_s4 = inlined_call_operand.vmem [shape: bf16[2,4,384], index: 4, kind: output, shape index: {}]  }
   0x1   :  { %v43_v2 = vunpack.c.l.s4 %v1015_v1  ;;  %v71_v3 = vld [vmem:[%s1196_s0] sm:$0xff]  ;;  %s1018_s21 = smov 110   ;;  %s1019_s22 = smov 109   ;;  %v916_v13 = vld [vmem:[%s1196_s0 + $0x8] sm:$0x3f]  ;;  %702 = vmatprep.mubr.bf16.mxu0 %v1024_v22  ;;  %743 = vmatprep.mubr.bf16.mxu1 %v1024_v22  ;;  %vm95_vm1 = vcmask 1031168  }
   0x2   :  { %v46_v4 = vshrl.u32 %v45_v0, 7  ;;  %v41_v6 = vcombine.low %v71_v3, %v71_v3  ;;  %v18_v7 = vld [vmem:[%s1196_s0] sm:$0x3f]  ;;  %v73_v9 = vcombine.high %v71_v3, %v71_v3  ;;  %s1020_s23 = smov 108   ;;  %s1021_s24 = smov 92   ;;  %v919_v14 = vld [vmem:[%s1196_s0 + $0x8] sm:$0xff]  ;;  %v291_v16 = vcombine.high %v916_v13, %v916_v13  ;;  %965 = vset.pattern.permute.xlu0 %v1024_v22 }
   0x3   :  { %v44_v5 = vunpack.c.0.s8 %v43_v2  ;;  %914 = vst.sshfl [vmem:[#allocation2] sm:$0xf pattern:$0x76325410] %v18_v7  ;;  %v20_v15 = vcombine.high %v18_v7, %v18_v7  ;;  %s1022_s29 = smov 91   ;;  %v312_v17 = vcombine.low %v919_v14, %v919_v14  ;;  %s1023_s30 = smov 90   ;;  %v342_v20 = vcombine.high %v919_v14, %v919_v14 }
   0x4   :  { %917 = vst.sshfl [vmem:[#allocation2 + $0xc] sm:$0xf pattern:$0x76325410] %v916_v13  ;;  %v566_v23 = vld [vmem:[%s1197_s3] sm:$0xf] }
   0x5   :  { %v1056_v8 = vsub.s32 %v44_v5, %v46_v4  ;;  %915 = vst.sshfl [vmem:[#allocation2 + $0x8] sm:$0x3 pattern:$0x76325410] %v20_v15  ;;  %v793_v24 = vld [vmem:[%s1198_s1] sm:$0xff]  ;;  %v952_v25 = vld [vmem:[%s1198_s1 + $0xa] sm:$0xff] }
   0x6   :  { %918 = vst.sshfl [vmem:[#allocation2 + $0x14] sm:$0x3 pattern:$0x76325410] %v291_v16  ;;  %v794_v26 = vunpack.c.l.bf16 %v793_v24  ;;  %v795_v27 = vunpack.c.h.bf16 %v793_v24  ;;  %v853_v28 = vunpack.c.l.bf16 %v952_v25  ;;  %v854_v31 = vunpack.c.h.bf16 %v952_v25 }
   0x7   :  { %v80_v10 = vrot.slane %v71_v3, %v1056_v8  ;;  %v48_v11 = vrot.slane %v41_v6, %v1056_v8  ;;  %v87_v12 = vrot.slane %v73_v9, %v1056_v8  ;;  %v326_v18 = vrot.slane %v919_v14, %v1056_v8 }
   0x8   :  { %v319_v19 = vrot.slane %v312_v17, %v1056_v8  ;;  %v356_v21 = vrot.slane %v342_v20, %v1056_v8  ;;  %v798_v29 = vcombine.high %v794_v26, %v794_v26  ;;  %v799_v30 = vcombine.high %v795_v27, %v795_v27 }
   0x9   :  { %88 = vrot.lane.b32.xlu1 %v80_v10, %s1016_s19  ;;  %56 = vrot.lane.b32.xlu0 %v48_v11, %s1017_s20  ;;  %v857_v32 = vcombine.high %v853_v28, %v853_v28  ;;  %v858_v36 = vcombine.high %v854_v31, %v854_v31  ;;  %vm64_vm2 = vcmask 1039360   ;;  %vm126_vm3 = vcmask 900096  }
   0xa   :  { %v966_v33 = vpack.i.bf16 %v798_v29, %v794_v26  ;;  %v971_v35 = vpack.i.bf16 %v799_v30, %v795_v27  ;;  %vm157_vm4 = vcmask 891904   ;;  %vm188_vm5 = vcmask 883712  }
   0xb   :  { %v976_v34 = vpack.i.bf16 %v857_v32, %v853_v28  ;;  %v981_v37 = vpack.i.bf16 %v858_v36, %v854_v31  ;;  %vm219_vm6 = vcmask 752640   ;;  %vm250_vm7 = vcmask 744448  }
   0xc   :  { %vm281_vm8 = vcmask 736256   ;;  %vm651_vm9 = vcmask 1041408   ;;  %vm647_vm10 = vcmask 293888  }
   0xd   :  { %90 = vrot.lane.b32.xlu1 %v87_v12, %s1016_s19  ;;  %58 = vrot.lane.b32.xlu0 %v80_v10, %s1017_s20 }
  0x11   :  { %121 = vrot.lane.b32.xlu1 %v80_v10, %s1018_s21  ;;  %119 = vrot.lane.b32.xlu0 %v48_v11, %s1018_s21 }
  0x15   :  { %152 = vrot.lane.b32.xlu1 %v87_v12, %s1019_s22  ;;  %150 = vrot.lane.b32.xlu0 %v80_v10, %s1019_s22 }
  0x19   :  { %183 = vrot.lane.b32.xlu1 %v80_v10, %s1020_s23  ;;  %181 = vrot.lane.b32.xlu0 %v48_v11, %s1020_s23 }
  0x1d   :  { %214 = vrot.lane.b32.xlu1 %v87_v12, %s1021_s24  ;;  %212 = vrot.lane.b32.xlu0 %v80_v10, %s1021_s24 }
  0x21   :  { %245 = vrot.lane.b32.xlu1 %v80_v10, %s1022_s29  ;;  %243 = vrot.lane.b32.xlu0 %v48_v11, %s1022_s29 }
  0x25   :  { %276 = vrot.lane.b32.xlu1 %v87_v12, %s1023_s30  ;;  %274 = vrot.lane.b32.xlu0 %v80_v10, %s1023_s30 }
  0x29   :  { %329 = vrot.lane.b32.xlu1 %v326_v18, %s1017_s20  ;;  %327 = vrot.lane.b32.xlu0 %v319_v19, %s1017_s20 }
  0x2d   :  { %359 = vrot.lane.b32.xlu1 %v356_v21, %s1016_s19  ;;  %357 = vrot.lane.b32.xlu0 %v326_v18, %s1016_s19 }
  0x31   :  { %389 = vrot.lane.b32.xlu1 %v326_v18, %s1018_s21  ;;  %387 = vrot.lane.b32.xlu0 %v319_v19, %s1018_s21 }
  0x35   :  { %419 = vrot.lane.b32.xlu1 %v356_v21, %s1019_s22  ;;  %417 = vrot.lane.b32.xlu0 %v326_v18, %s1019_s22 }
  0x39   :  { %449 = vrot.lane.b32.xlu1 %v326_v18, %s1020_s23  ;;  %447 = vrot.lane.b32.xlu0 %v319_v19, %s1020_s23 }
  0x3d   :  { %479 = vrot.lane.b32.xlu1 %v356_v21, %s1021_s24  ;;  %477 = vrot.lane.b32.xlu0 %v326_v18, %s1021_s24 }
  0x41   :  { %509 = vrot.lane.b32.xlu1 %v326_v18, %s1022_s29  ;;  %507 = vrot.lane.b32.xlu0 %v319_v19, %s1022_s29 }
  0x45   :  { %539 = vrot.lane.b32.xlu1 %v356_v21, %s1023_s30  ;;  %537 = vrot.lane.b32.xlu0 %v326_v18, %s1023_s30 }
  0x49   :  { %569 = vperm.xlu0 %965, %v566_v23   ;;  %967 = vrot.lane.b32.xlu1 %v966_v33, %s1023_s30 }
  0x4d   :  { %977 = vrot.lane.b32.xlu0 %v976_v34, %s1023_s30  ;;  %972 = vrot.lane.b32.xlu1 %v971_v35, %s1023_s30 }
  0x51   :  { %982 = vrot.lane.b32.xlu1 %v981_v37, %s1023_s30 }
  0x7b   :  { %v89_v38 = vpop.permute.xlu1 %88  ;;  %v57_v39 = vpop.permute.xlu0 %56 }
  0x7c   :  { %v92_v42 = vrot.slane %v89_v38, 4  ;;  %v60_v43 = vrot.slane %v57_v39, 4 }
  0x7f   :  { %v91_v40 = vpop.permute.xlu1 %90  ;;  %v59_v41 = vpop.permute.xlu0 %58 }
  0x80   :  { %v93_v44 = vrot.slane %v91_v40, 4  ;;  %v61_v45 = vrot.slane %v59_v41, 4 }
  0x82   :  { %v94_v46 = vsel %vm62_vm0, %v92_v42, %v93_v44  ;;  %v97_v47 = vsel %vm95_vm1, %v91_v40, %v93_v44  ;;  %v63_v48 = vsel %vm62_vm0, %v60_v43, %v61_v45  ;;  %v66_v49 = vsel %vm64_vm2, %v59_v41, %v61_v45 }
  0x83   :  { %v96_v50 = vsel %vm95_vm1, %v89_v38, %v94_v46  ;;  %101 = vst [vmem:[#allocation2 + $0x20] sm:$0x3] %v97_v47  ;;  %v65_v51 = vsel %vm64_vm2, %v57_v39, %v63_v48  ;;  %70 = vst [vmem:[#allocation2 + $0x8] sm:$0xc] %v66_v49  ;;  %v122_v52 = vpop.permute.xlu1 %121  ;;  %v120_v53 = vpop.permute.xlu0 %119 }
  0x84   :  { %100 = vst [vmem:[#allocation2 + $0x18] sm:$0x33] %v96_v50  ;;  %69 = vst [vmem:[#allocation2] sm:$0xcc] %v65_v51  ;;  %v124_v54 = vrot.slane %v122_v52, 4  ;;  %v123_v55 = vrot.slane %v120_v53, 4 }
  0x86   :  { %v128_v56 = vsel %vm126_vm3, %v122_v52, %v124_v54  ;;  %v125_v57 = vsel %vm62_vm0, %v123_v55, %v124_v54 }
  0x87   :  { %132 = vst [vmem:[#allocation2 + $0x20] sm:$0xc] %v128_v56  ;;  %v127_v58 = vsel %vm126_vm3, %v120_v53, %v125_v57  ;;  %v153_v59 = vpop.permute.xlu1 %152  ;;  %v151_v60 = vpop.permute.xlu0 %150 }
  0x88   :  { %131 = vst [vmem:[#allocation2 + $0x18] sm:$0xcc] %v127_v58  ;;  %v155_v61 = vrot.slane %v153_v59, 4  ;;  %v154_v62 = vrot.slane %v151_v60, 4 }
  0x8a   :  { %v159_v63 = vsel %vm157_vm4, %v153_v59, %v155_v61  ;;  %v156_v0 = vsel %vm62_vm0, %v154_v62, %v155_v61 }
  0x8b   :  { %163 = vst [vmem:[#allocation2 + $0x38] sm:$0x3] %v159_v63  ;;  %v158_v1 = vsel %vm157_vm4, %v151_v60, %v156_v0  ;;  %v184_v2 = vpop.permute.xlu1 %183  ;;  %v182_v3 = vpop.permute.xlu0 %181  ;;  %v1152_v63 = vld [vmem:[%s1199_s2] sm:$0x3] }
  0x8c   :  { %162 = vst [vmem:[#allocation2 + $0x30] sm:$0x33] %v158_v1  ;;  %v186_v4 = vrot.slane %v184_v2, 4  ;;  %v185_v5 = vrot.slane %v182_v3, 4 }
  0x8e   :  { %v190_v6 = vsel %vm188_vm5, %v184_v2, %v186_v4  ;;  %v187_v7 = vsel %vm62_vm0, %v185_v5, %v186_v4 }
  0x8f   :  { %194 = vst [vmem:[#allocation2 + $0x38] sm:$0xc] %v190_v6  ;;  %v189_v9 = vsel %vm188_vm5, %v182_v3, %v187_v7  ;;  %v215_v10 = vpop.permute.xlu1 %214  ;;  %v213_v11 = vpop.permute.xlu0 %212  ;;  %v990_v12 = vld [vmem:[#allocation2 + $0x4] ss:$24 sps:$4 sm:$0xff]   ;;  %v992_v13 = vld [vmem:[#allocation2] ss:$24 sps:$4 sm:$0xff]  }
  0x90   :  { %193 = vst [vmem:[#allocation2 + $0x30] sm:$0xcc] %v189_v9  ;;  %v217_v14 = vrot.slane %v215_v10, 4  ;;  %v216_v15 = vrot.slane %v213_v11, 4  ;;  %670 = vmatprep.subr.bf16.mxu0 %v990_v12 }
  0x91   :  { %671 = vmatpush1.bf16.msra.mxu0 %v992_v13 }
  0x92   :  { %v221_v16 = vsel %vm219_vm6, %v215_v10, %v217_v14  ;;  %v218_v17 = vsel %vm62_vm0, %v216_v15, %v217_v14 }
  0x93   :  { %225 = vst [vmem:[#allocation2 + $0x50] sm:$0x3] %v221_v16  ;;  %v220_v18 = vsel %vm219_vm6, %v213_v11, %v218_v17  ;;  %v246_v19 = vpop.permute.xlu1 %245  ;;  %v244_v20 = vpop.permute.xlu0 %243 }
  0x94   :  { %224 = vst [vmem:[#allocation2 + $0x48] sm:$0x33] %v220_v18  ;;  %v248_v21 = vrot.slane %v246_v19, 4  ;;  %v247_v23 = vrot.slane %v244_v20, 4 }
  0x96   :  { %v252_v24 = vsel %vm250_vm7, %v246_v19, %v248_v21  ;;  %v249_v25 = vsel %vm62_vm0, %v247_v23, %v248_v21 }
  0x97   :  { %256 = vst [vmem:[#allocation2 + $0x50] sm:$0xc] %v252_v24  ;;  %v251_v26 = vsel %vm250_vm7, %v244_v20, %v249_v25  ;;  %v277_v27 = vpop.permute.xlu1 %276  ;;  %v275_v28 = vpop.permute.xlu0 %274 }
  0x98   :  { %255 = vst [vmem:[#allocation2 + $0x48] sm:$0xcc] %v251_v26  ;;  %v279_v29 = vrot.slane %v277_v27, 4  ;;  %v278_v30 = vrot.slane %v275_v28, 4 }
  0x9a   :  { %v283_v31 = vsel %vm281_vm8, %v277_v27, %v279_v29  ;;  %v280_v32 = vsel %vm62_vm0, %v278_v30, %v279_v29 }
  0x9b   :  { %287 = vst [vmem:[#allocation2 + $0x68] sm:$0x3] %v283_v31  ;;  %v282_v33 = vsel %vm281_vm8, %v275_v28, %v280_v32  ;;  %v330_v34 = vpop.permute.xlu1 %329  ;;  %v328_v35 = vpop.permute.xlu0 %327 }
  0x9c   :  { %286 = vst [vmem:[#allocation2 + $0x60] sm:$0x33] %v282_v33  ;;  %v332_v36 = vrot.slane %v330_v34, 4  ;;  %v331_v37 = vrot.slane %v328_v35, 4 }
  0x9e   :  { %v335_v38 = vsel %vm64_vm2, %v330_v34, %v332_v36  ;;  %v333_v39 = vsel %vm62_vm0, %v331_v37, %v332_v36 }
  0x9f   :  { %339 = vst [vmem:[#allocation2 + $0x14] sm:$0xc] %v335_v38  ;;  %v334_v40 = vsel %vm64_vm2, %v328_v35, %v333_v39  ;;  %v360_v41 = vpop.permute.xlu1 %359  ;;  %v358_v42 = vpop.permute.xlu0 %357  ;;  %v993_v43 = vld [vmem:[#allocation2 + $0x34] ss:$24 sps:$4 sm:$0xff]   ;;  %v995_v44 = vld [vmem:[#allocation2 + $0x30] ss:$24 sps:$4 sm:$0xff]  }
  0xa0   :  { %338 = vst [vmem:[#allocation2 + $0xc] sm:$0xcc] %v334_v40  ;;  %v362_v45 = vrot.slane %v360_v41, 4  ;;  %v361_v46 = vrot.slane %v358_v42, 4  ;;  %672 = vmatprep.subr.bf16.mxu0 %v993_v43 }
  0xa1   :  { %673 = vmatpush1.bf16.msra.mxu0 %v995_v44 }
  0xa2   :  { %v365_v47 = vsel %vm95_vm1, %v360_v41, %v362_v45  ;;  %v363_v48 = vsel %vm62_vm0, %v361_v46, %v362_v45  ;;  %v1010_v41 = vld [vmem:[#allocation2 + $0x38] ss:$24 sps:$4 sm:$0xff]  }
  0xa3   :  { %369 = vst [vmem:[#allocation2 + $0x2c] sm:$0x3] %v365_v47  ;;  %v364_v49 = vsel %vm95_vm1, %v358_v42, %v363_v48  ;;  %v390_v50 = vpop.permute.xlu1 %389  ;;  %v388_v51 = vpop.permute.xlu0 %387  ;;  %v563_v52 = vld [vmem:[#allocation2 + $0x60] sm:$0x33] }
  0xa4   :  { %368 = vst [vmem:[#allocation2 + $0x24] sm:$0x33] %v364_v49  ;;  %v392_v53 = vrot.slane %v390_v50, 4  ;;  %v391_v54 = vrot.slane %v388_v51, 4  ;;  %v940_v55 = vcombine.high %v563_v52, %v563_v52  ;;  %v939_v56 = vcombine.low %v563_v52, %v563_v52 }
  0xa6   :  { %v395_v57 = vsel %vm126_vm3, %v390_v50, %v392_v53  ;;  %v393_v58 = vsel %vm62_vm0, %v391_v54, %v392_v53  ;;  %945 = vmatprep.subr.msk.bf16.mxu0 %vm651_vm9, %v940_v55  ;;  %v653_v59 = vsel %vm651_vm9, %v939_v56, 0 }
  0xa7   :  { %399 = vst [vmem:[#allocation2 + $0x2c] sm:$0xc] %v395_v57  ;;  %v394_v60 = vsel %vm126_vm3, %v388_v51, %v393_v58  ;;  %v420_v61 = vpop.permute.xlu1 %419  ;;  %v418_v62 = vpop.permute.xlu0 %417  ;;  %675 = vmatpush1.bf16.msra.mxu0 %v653_v59 }
  0xa8   :  { %398 = vst [vmem:[#allocation2 + $0x24] sm:$0xcc] %v394_v60  ;;  %v422_v0 = vrot.slane %v420_v61, 4  ;;  %v421_v1 = vrot.slane %v418_v62, 4 }
  0xaa   :  { %v425_v2 = vsel %vm157_vm4, %v420_v61, %v422_v0  ;;  %v423_v3 = vsel %vm62_vm0, %v421_v1, %v422_v0  ;;  %946 = vmatmul.mubr.msk.bf16.vlgmr.msra.gmra.mrb[0].mxu0 %vm647_vm10, %v1152_v63 }
  0xab   :  { %429 = vst [vmem:[#allocation2 + $0x44] sm:$0x3] %v425_v2  ;;  %v424_v4 = vsel %vm157_vm4, %v418_v62, %v423_v3  ;;  %v450_v5 = vpop.permute.xlu1 %449  ;;  %v448_v6 = vpop.permute.xlu0 %447  ;;  %784 = vmatprep.mubr.bf16.mxu0 %v1024_v22  ;;  %v1004_v22 = vld [vmem:[#allocation2 + $0x8] ss:$24 sps:$4 sm:$0xff]  }
  0xac   :  { %428 = vst [vmem:[#allocation2 + $0x3c] sm:$0x33] %v424_v4  ;;  %v452_v7 = vrot.slane %v450_v5, 4  ;;  %v451_v9 = vrot.slane %v448_v6, 4 }
  0xae   :  { %v455_v10 = vsel %vm188_vm5, %v450_v5, %v452_v7  ;;  %v453_v11 = vsel %vm62_vm0, %v451_v9, %v452_v7  ;;  %v1003_v19 = vld [vmem:[#allocation2 + $0x14] ss:$24 sps:$4 sm:$0xff]  }
  0xaf   :  { %459 = vst [vmem:[#allocation2 + $0x44] sm:$0xc] %v455_v10  ;;  %v454_v12 = vsel %vm188_vm5, %v448_v6, %v453_v11  ;;  %v480_v13 = vpop.permute.xlu1 %479  ;;  %v478_v14 = vpop.permute.xlu0 %477  ;;  %v999_v15 = vld [vmem:[#allocation2 + $0xc] ss:$24 sps:$4 sm:$0xff]   ;;  %v1001_v18 = vld [vmem:[#allocation2 + $0x10] ss:$24 sps:$4 sm:$0xff]   ;;  %752 = vmatprep.subr.bf16.mxu0 %v1003_v19 }
  0xb0   :  { %458 = vst [vmem:[#allocation2 + $0x3c] sm:$0xcc] %v454_v12  ;;  %v482_v16 = vrot.slane %v480_v13, 4  ;;  %v481_v17 = vrot.slane %v478_v14, 4  ;;  %711 = vmatprep.subr.bf16.mxu1 %v999_v15  ;;  %753 = vmatpush1.bf16.msra.mxu0 %v1001_v18 }
  0xb1   :  { %712 = vmatpush1.bf16.msra.mxu1 %v1004_v22 }
  0xb2   :  { %v485_v20 = vsel %vm219_vm6, %v480_v13, %v482_v16  ;;  %v483_v21 = vsel %vm62_vm0, %v481_v17, %v482_v16 }
  0xb3   :  { %489 = vst [vmem:[#allocation2 + $0x5c] sm:$0x3] %v485_v20  ;;  %v484_v23 = vsel %vm219_vm6, %v478_v14, %v483_v21  ;;  %v510_v24 = vpop.permute.xlu1 %509  ;;  %v508_v25 = vpop.permute.xlu0 %507 }
  0xb4   :  { %488 = vst [vmem:[#allocation2 + $0x54] sm:$0x33] %v484_v23  ;;  %v512_v26 = vrot.slane %v510_v24, 4  ;;  %v511_v27 = vrot.slane %v508_v25, 4 }
  0xb6   :  { %v515_v28 = vsel %vm250_vm7, %v510_v24, %v512_v26  ;;  %v513_v29 = vsel %vm62_vm0, %v511_v27, %v512_v26 }
  0xb7   :  { %519 = vst [vmem:[#allocation2 + $0x5c] sm:$0xc] %v515_v28  ;;  %v514_v30 = vsel %vm250_vm7, %v508_v25, %v513_v29  ;;  %v540_v31 = vpop.permute.xlu1 %539  ;;  %v538_v32 = vpop.permute.xlu0 %537 }
  0xb8   :  { %518 = vst [vmem:[#allocation2 + $0x54] sm:$0xcc] %v514_v30  ;;  %v542_v33 = vrot.slane %v540_v31, 4  ;;  %v541_v34 = vrot.slane %v538_v32, 4 }
  0xba   :  { %v545_v35 = vsel %vm281_vm8, %v540_v31, %v542_v33  ;;  %v543_v36 = vsel %vm62_vm0, %v541_v34, %v542_v33 }
  0xbb   :  { %549 = vst [vmem:[#allocation2 + $0x74] sm:$0x3] %v545_v35  ;;  %v544_v37 = vsel %vm281_vm8, %v538_v32, %v543_v36  ;;  %v968_v50 = vpop.permute.xlu1 %967 }
  0xbc   :  { %548 = vst [vmem:[#allocation2 + $0x6c] sm:$0x33] %v544_v37  ;;  %v970_v52 = vunpack.i.h.bf16 %v968_v50  ;;  %v969_v53 = vunpack.i.l.bf16 %v968_v50 }
  0xbe   :  { %v1009_v40 = vld [vmem:[#allocation2 + $0x44] ss:$24 sps:$4 sm:$0xff]   ;;  %v809_v56 = vsel %vm281_vm8, %v969_v53, %v970_v52 }
  0xbf   :  { %v1005_v38 = vld [vmem:[#allocation2 + $0x3c] ss:$24 sps:$4 sm:$0xff]   ;;  %v1007_v39 = vld [vmem:[#allocation2 + $0x40] ss:$24 sps:$4 sm:$0xff]   ;;  %754 = vmatprep.subr.bf16.mxu0 %v1009_v40  ;;  %v973_v51 = vpop.permute.xlu1 %972 }
  0xc0   :  { %713 = vmatprep.subr.bf16.mxu1 %v1005_v38  ;;  %755 = vmatpush1.bf16.msra.mxu0 %v1007_v39  ;;  %v974_v54 = vunpack.i.l.bf16 %v973_v51  ;;  %v975_v14 = vunpack.i.h.bf16 %v973_v51 }
  0xc1   :  { %714 = vmatpush1.bf16.msra.mxu1 %v1010_v41 }
  0xc2   :  { %v810_v60 = vsel %vm281_vm8, %v970_v52, %v974_v54  ;;  %v811_v24 = vsel %vm281_vm8, %v974_v54, %v975_v14 }
  0xc3   :  { %v564_v42 = vld [vmem:[#allocation2 + $0x68] sm:$0x33]  ;;  %v565_v43 = vld [vmem:[#allocation2 + $0x70] sm:$0x33]  ;;  %v983_v7 = vpop.permute.xlu1 %982 }
  0xc4   :  { %v942_v44 = vcombine.high %v564_v42, %v564_v42  ;;  %v944_v45 = vcombine.high %v565_v43, %v565_v43  ;;  %v941_v46 = vcombine.low %v564_v42, %v564_v42  ;;  %v943_v47 = vcombine.low %v565_v43, %v565_v43 }
  0xc5   :  { %v984_v10 = vunpack.i.l.bf16 %v983_v7  ;;  %v985_v12 = vunpack.i.h.bf16 %v983_v7 }
  0xc6   :  { %947 = vmatprep.subr.msk.bf16.mxu1 %vm651_vm9, %v942_v44  ;;  %949 = vmatprep.subr.msk.bf16.mxu0 %vm651_vm9, %v944_v45  ;;  %v659_v48 = vsel %vm651_vm9, %v941_v46, 0  ;;  %v665_v49 = vsel %vm651_vm9, %v943_v47, 0 }
  0xc7   :  { %716 = vmatpush1.bf16.msra.mxu1 %v659_v48  ;;  %757 = vmatpush1.bf16.msra.mxu0 %v665_v49  ;;  %v869_v23 = vsel %vm281_vm8, %v984_v10, %v985_v12 }
  0xc8   :  { %v570_v55 = vpop.permute.xlu0 %569 }
  0xca   :  { %948 = vmatmul.mubr.msk.bf16.vlgmr.msra.gmra.mrb[0].mxu1 %vm647_vm10, %v1152_v63  ;;  %950 = vmatmul.mubr.msk.bf16.vlgmr.msra.gmra.mrb[4].mxu0 %vm647_vm10, %v1152_v63 }
  0xcc   :  { %v978_v9 = vpop.permute.xlu0 %977 }
  0xcd   :  { %v980_v11 = vunpack.i.h.bf16 %v978_v9  ;;  %v979_v13 = vunpack.i.l.bf16 %v978_v9 }
  0xcf   :  { %v868_v17 = vsel %vm281_vm8, %v980_v11, %v984_v10  ;;  %v867_v20 = vsel %vm281_vm8, %v979_v13, %v980_v11 }
 0x17d   :  { %v704_v57 = vpop.f32.mrb[0].mxu0 }
 0x17e   :  { %v705_v58 = vadd.f32 %v704_v57, %v570_v55  ;;  %v706_v59 = vpop.f32.mrb[1].mxu0 }
 0x17f   :  { %v707_v61 = vadd.f32 %v706_v59, %v570_v55  ;;  %v708_v62 = vpop.f32.mrb[2].mxu0 }
 0x180   :  { %v815_v0 = vadd.f32 %v809_v56, %v705_v58  ;;  %v709_v1 = vpop.f32.mrb[3].mxu0 }
 0x181   :  { %v816_v2 = vadd.f32 %v810_v60, %v707_v61 }
 0x182   :  { %vm818_vm11 = vcmp.gt.f32.partialorder %v815_v0, 0.0  ;;  %v821_v63 = vmul.f32 0.2, %v815_v0 }
 0x183   :  { %vm819_vm12 = vcmp.gt.f32.partialorder %v816_v2, 0.0  ;;  %v822_v3 = vmul.f32 0.2, %v816_v2 }
 0x184   :  { %v824_v4 = vsel %vm818_vm11, %v815_v0, %v821_v63 }
 0x185   :  { %v825_v5 = vsel %vm819_vm12, %v816_v2, %v822_v3 }
 0x186   :  { %v951_v6 = vpack.c.bf16 %v825_v5, %v824_v4 }
 0x188   :  { %v840_v46 = vrot.slane %v951_v6, %v1056_v8 }
 0x19d   :  { %v745_v15 = vpop.f32.mrb[0].mxu1  ;;  %v786_v16 = vpop.f32.mrb[4].mxu0 }
 0x19e   :  { %v746_v18 = vadd.f32 %v745_v15, %v570_v55  ;;  %v787_v19 = vadd.f32 %v786_v16, %v570_v55  ;;  %v747_v22 = vpop.f32.mrb[1].mxu1  ;;  %v788_v21 = vpop.f32.mrb[5].mxu0 }
 0x19f   :  { %v748_v25 = vadd.f32 %v747_v22, %v570_v55  ;;  %v789_v26 = vadd.f32 %v788_v21, %v570_v55  ;;  %v749_v27 = vpop.f32.mrb[2].mxu1  ;;  %v790_v28 = vpop.f32.mrb[6].mxu0 }
 0x1a0   :  { %v817_v29 = vadd.f32 %v811_v24, %v746_v18  ;;  %v874_v30 = vadd.f32 %v868_v17, %v787_v19  ;;  %v750_v31 = vpop.f32.mrb[3].mxu1  ;;  %v791_v32 = vpop.f32.mrb[7].mxu0 }
 0x1a1   :  { %v873_v33 = vadd.f32 %v867_v20, %v748_v25  ;;  %v875_v34 = vadd.f32 %v869_v23, %v789_v26 }
 0x1a2   :  { %vm820_vm13 = vcmp.gt.f32.partialorder %v817_v29, 0.0  ;;  %v823_v35 = vmul.f32 0.2, %v817_v29  ;;  %vm877_vm14 = vcmp.gt.f32.partialorder %v874_v30, 0.0  ;;  %v880_v36 = vmul.f32 0.2, %v874_v30 }
 0x1a3   :  { %vm876_vm15 = vcmp.gt.f32.partialorder %v873_v33, 0.0  ;;  %v879_v37 = vmul.f32 0.2, %v873_v33  ;;  %vm878_vm0 = vcmp.gt.f32.partialorder %v875_v34, 0.0  ;;  %v881_v38 = vmul.f32 0.2, %v875_v34 }
 0x1a4   :  { %v826_v39 = vsel %vm820_vm13, %v817_v29, %v823_v35  ;;  %v883_v40 = vsel %vm877_vm14, %v874_v30, %v880_v36 }
 0x1a5   :  { %v829_v41 = vpack.c.bf16 %v826_v39, %v826_v39  ;;  %v882_v42 = vsel %vm876_vm15, %v873_v33, %v879_v37  ;;  %v884_v43 = vsel %vm878_vm0, %v875_v34, %v881_v38 }
 0x1a6   :  { %v953_v44 = vpack.c.bf16 %v883_v40, %v882_v42  ;;  %v887_v45 = vpack.c.bf16 %v884_v43, %v884_v43 }
 0x1a7   :  { %v847_v47 = vrot.slane %v829_v41, %v1056_v8 }
 0x1a8   :  { %v898_v48 = vrot.slane %v953_v44, %v1056_v8  ;;  %v905_v49 = vrot.slane %v887_v45, %v1056_v8 }
 0x1a9   :  { %v848_v50 = vcombine.low %v840_v46, %v847_v47 }
 0x1aa   :  { %v906_v51 = vcombine.low %v898_v48, %v905_v49 }
 0x1ab   :  { %850 = vst [vmem:[%s1200_s4] sm:$0x3f] %v848_v50 }
 0x1ac   :  { %954 = vst [vmem:[%s1200_s4 + $0x6] sm:$0x3f] %v906_v51 }

// kernel: residual_block_decoder.2
= control target key start
LH: loop header
LB: loop body
LE: loop exit
PB: predicated region body
PF: predicated region fallthrough
CT: control target
= control target key end

     0   :  { %v47_v0 = vlaneseq  ;;  %v1318_v3 = vmov 1983009808   ;;  %s1319_s19 = smov 126   ;;  %s1320_s24 = smov 127   ;;  %v1327_v32 = vmov 0   ;;  %vm75_vm0 = vcmask 1043456   ;;  %s1569_s0 = inlined_call_operand.vmem [shape: bf16[2,4,640], index: 0, kind: input, shape index: {}]   ;;  %s1570_s2 = inlined_call_operand.vmem [shape: f32[4,1], index: 2, kind: input, shape index: {}]   ;;  %s1571_s1 = inlined_call_operand.vmem [shape: bf16[4,36], index: 1, kind: input, shape index: {}]   ;;  %s1572_s3 = inlined_call_operand.vmem [shape: f32[1,512], index: 3, kind: input, shape index: {}]   ;;  %s1573_s4 = inlined_call_operand.vmem [shape: bf16[2,4,512], index: 4, kind: output, shape index: {}]  }
   0x1   :  { %v1223_v1 = vld.sshfl [vmem:[%s1569_s0 + $0x8] sm:$0x3 pattern:$0x76325410]  ;;  %v39_v2 = vld [vmem:[%s1569_s0] sm:$0xff]  ;;  %v45_v4 = vunpack.c.l.s4 %v1318_v3  ;;  %v1230_v11 = vld [vmem:[%s1569_s0 + $0xa] sm:$0xff]  ;;  %954 = vmatprep.mubr.bf16.mxu0 %v1327_v32  ;;  %995 = vmatprep.mubr.bf16.mxu1 %v1327_v32 }
   0x2   :  { %115 = vrot.lane.b32.xlu1 %v1223_v1, %s1319_s19  ;;  %v1360_v5 = vshrl.u32 %v47_v0, 7  ;;  %v89_v6 = vcombine.high %v39_v2, %v39_v2  ;;  %1221 = vst.sshfl [vmem:[#allocation2] sm:$0xf pattern:$0x76325410] %v39_v2  ;;  %v43_v7 = vcombine.low %v39_v2, %v39_v2  ;;  %v466_v12 = vcombine.high %v1230_v11, %v1230_v11  ;;  %s1321_s25 = smov 110  }
   0x3   :  { %v46_v8 = vunpack.c.0.s8 %v45_v4  ;;  %v1299_v9 = vld [vmem:[%s1569_s0 + $0x8] ss:$0 sps:$4 sm:$0x33]   ;;  %s1322_s28 = smov 109   ;;  %s1323_s29 = smov 108   ;;  %v422_v24 = vcombine.low %v1230_v11, %v1230_v11  ;;  %1297 = vset.pattern.permute.xlu0 %v1327_v32  ;;  %vm77_vm1 = vcmask 1039360  }
   0x4   :  { %1222 = vst.sshfl [vmem:[#allocation2 + $0x8] sm:$0xf pattern:$0x76325410] %v89_v6  ;;  %s1324_s6 = smov 92   ;;  %s1325_s7 = smov 91  }
   0x5   :  { %v1366_v10 = vsub.s32 %v46_v8, %v1360_v5  ;;  %1228 = vst.sshfl [vmem:[#allocation2 + $0x10] sm:$0xf pattern:$0x76325410] %v1230_v11  ;;  %s1326_s10 = smov 90   ;;  %vm121_vm2 = vcmask 1031168  }
   0x6   :  { %1229 = vst.sshfl [vmem:[#allocation2 + $0x18] sm:$0xf pattern:$0x76325410] %v466_v12  ;;  %v787_v37 = vld [vmem:[%s1570_s2] sm:$0xf] }
   0x7   :  { %v50_v13 = vrot.slane %v43_v7, %v1366_v10  ;;  %v65_v14 = vrot.slane %v1299_v9, %v1366_v10  ;;  %v57_v15 = vrot.slane %v39_v2, %v1366_v10  ;;  %v103_v16 = vrot.slane %v89_v6, %v1366_v10  ;;  %v1301_v17 = vld [vmem:[%s1569_s0 + $0x8] ss:$0 sps:$4 sm:$0x33]   ;;  %v1305_v26 = vld [vmem:[%s1569_s0 + $0x12] ss:$0 sps:$4 sm:$0x33]  }
   0x8   :  { %v155_v18 = vrot.slane %v1301_v17, %v1366_v10  ;;  %v1302_v19 = vld [vmem:[%s1569_s0 + $0x8] ss:$0 sps:$4 sm:$0x33]   ;;  %v436_v23 = vrot.slane %v1230_v11, %v1366_v10  ;;  %v429_v25 = vrot.slane %v422_v24, %v1366_v10  ;;  %v444_v27 = vrot.slane %v1305_v26, %v1366_v10  ;;  %v1307_v30 = vld [vmem:[%s1569_s0 + $0x12] ss:$0 sps:$4 sm:$0x33]  }
   0x9   :  { %66 = vrot.lane.b32.xlu0 %v50_v13, %s1320_s24  ;;  %70 = vrot.lane.b32.xlu1 %v65_v14, %s1320_s24  ;;  %v244_v20 = vrot.slane %v1302_v19, %v1366_v10  ;;  %v1303_v21 = vld [vmem:[%s1569_s0 + $0x8] ss:$0 sps:$4 sm:$0x33]   ;;  %v480_v29 = vrot.slane %v466_v12, %v1366_v10  ;;  %v531_v31 = vrot.slane %v1307_v30, %v1366_v10  ;;  %v1308_v33 = vld [vmem:[%s1569_s0 + $0x12] ss:$0 sps:$4 sm:$0x33]  }
   0xa   :  { %v333_v22 = vrot.slane %v1303_v21, %v1366_v10  ;;  %v1234_v28 = vld.sshfl [vmem:[%s1569_s0 + $0x12] sm:$0x3 pattern:$0x76325410]  ;;  %v618_v34 = vrot.slane %v1308_v33, %v1366_v10  ;;  %vm166_vm3 = vcmask 900096   ;;  %vm210_vm4 = vcmask 891904  }
   0xb   :  { %v1309_v35 = vld [vmem:[%s1569_s0 + $0x12] ss:$0 sps:$4 sm:$0x33]   ;;  %vm255_vm5 = vcmask 883712   ;;  %vm299_vm6 = vcmask 752640   ;;  %vm344_vm7 = vcmask 744448  }
   0xc   :  { %v705_v36 = vrot.slane %v1309_v35, %v1366_v10  ;;  %vm388_vm8 = vcmask 736256   ;;  %vm897_vm9 = vcmask 1041408   ;;  %vm893_vm10 = vcmask 293888  }
   0xd   :  { %68 = vrot.lane.b32.xlu0 %v57_v15, %s1320_s24  ;;  %111 = vrot.lane.b32.xlu1 %v57_v15, %s1319_s19 }
  0x11   :  { %113 = vrot.lane.b32.xlu0 %v103_v16, %s1319_s19  ;;  %158 = vrot.lane.b32.xlu1 %v57_v15, %s1321_s25 }
  0x15   :  { %156 = vrot.lane.b32.xlu0 %v50_v13, %s1321_s25  ;;  %200 = vrot.lane.b32.xlu1 %v57_v15, %s1322_s28 }
  0x19   :  { %160 = vrot.lane.b32.xlu0 %v155_v18, %s1321_s25  ;;  %204 = vrot.lane.b32.xlu1 %v1223_v1, %s1322_s28 }
  0x1d   :  { %202 = vrot.lane.b32.xlu0 %v103_v16, %s1322_s28  ;;  %247 = vrot.lane.b32.xlu1 %v57_v15, %s1323_s29 }
  0x21   :  { %245 = vrot.lane.b32.xlu0 %v50_v13, %s1323_s29  ;;  %289 = vrot.lane.b32.xlu1 %v57_v15, %s1324_s6 }
  0x25   :  { %249 = vrot.lane.b32.xlu0 %v244_v20, %s1323_s29  ;;  %293 = vrot.lane.b32.xlu1 %v1223_v1, %s1324_s6 }
  0x29   :  { %291 = vrot.lane.b32.xlu0 %v103_v16, %s1324_s6  ;;  %336 = vrot.lane.b32.xlu1 %v57_v15, %s1325_s7 }
  0x2d   :  { %334 = vrot.lane.b32.xlu0 %v50_v13, %s1325_s7  ;;  %378 = vrot.lane.b32.xlu1 %v57_v15, %s1326_s10 }
  0x31   :  { %338 = vrot.lane.b32.xlu0 %v333_v22, %s1325_s7  ;;  %382 = vrot.lane.b32.xlu1 %v1223_v1, %s1326_s10 }
  0x35   :  { %380 = vrot.lane.b32.xlu0 %v103_v16, %s1326_s10  ;;  %447 = vrot.lane.b32.xlu1 %v436_v23, %s1320_s24 }
  0x39   :  { %445 = vrot.lane.b32.xlu0 %v429_v25, %s1320_s24  ;;  %488 = vrot.lane.b32.xlu1 %v436_v23, %s1319_s19 }
  0x3d   :  { %449 = vrot.lane.b32.xlu0 %v444_v27, %s1320_s24  ;;  %492 = vrot.lane.b32.xlu1 %v1234_v28, %s1319_s19 }
  0x41   :  { %490 = vrot.lane.b32.xlu0 %v480_v29, %s1319_s19  ;;  %534 = vrot.lane.b32.xlu1 %v436_v23, %s1321_s25 }
  0x45   :  { %532 = vrot.lane.b32.xlu0 %v429_v25, %s1321_s25  ;;  %575 = vrot.lane.b32.xlu1 %v436_v23, %s1322_s28 }
  0x49   :  { %536 = vrot.lane.b32.xlu0 %v531_v31, %s1321_s25  ;;  %579 = vrot.lane.b32.xlu1 %v1234_v28, %s1322_s28 }
  0x4d   :  { %577 = vrot.lane.b32.xlu0 %v480_v29, %s1322_s28  ;;  %621 = vrot.lane.b32.xlu1 %v436_v23, %s1323_s29 }
  0x51   :  { %619 = vrot.lane.b32.xlu0 %v429_v25, %s1323_s29  ;;  %662 = vrot.lane.b32.xlu1 %v436_v23, %s1324_s6 }
  0x55   :  { %623 = vrot.lane.b32.xlu0 %v618_v34, %s1323_s29  ;;  %666 = vrot.lane.b32.xlu1 %v1234_v28, %s1324_s6 }
  0x59   :  { %664 = vrot.lane.b32.xlu0 %v480_v29, %s1324_s6  ;;  %708 = vrot.lane.b32.xlu1 %v436_v23, %s1325_s7 }
  0x5d   :  { %706 = vrot.lane.b32.xlu0 %v429_v25, %s1325_s7  ;;  %749 = vrot.lane.b32.xlu1 %v436_v23, %s1326_s10 }
  0x61   :  { %710 = vrot.lane.b32.xlu0 %v705_v36, %s1325_s7  ;;  %753 = vrot.lane.b32.xlu1 %v1234_v28, %s1326_s10 }
  0x65   :  { %751 = vrot.lane.b32.xlu0 %v480_v29, %s1326_s10 }
  0x69   :  { %790 = vperm.xlu0 %1297, %v787_v37  }
  0x74   :  { %v116_v38 = vpop.permute.xlu1 %115 }
  0x75   :  { %v119_v53 = vrot.slane %v116_v38, 4 }
  0x7b   :  { %v67_v39 = vpop.permute.xlu0 %66  ;;  %v71_v40 = vpop.permute.xlu1 %70 }
  0x7c   :  { %v74_v41 = vrot.slane %v71_v40, 4  ;;  %v72_v44 = vrot.slane %v67_v39, 4 }
  0x7f   :  { %v69_v42 = vpop.permute.xlu0 %68  ;;  %v112_v43 = vpop.permute.xlu1 %111 }
  0x80   :  { %v73_v45 = vrot.slane %v69_v42, 4  ;;  %v117_v48 = vrot.slane %v112_v43, 4 }
  0x82   :  { %v76_v46 = vsel %vm75_vm0, %v72_v44, %v73_v45  ;;  %v79_v47 = vsel %vm75_vm0, %v73_v45, %v74_v41 }
  0x83   :  { %v78_v49 = vsel %vm77_vm1, %v67_v39, %v76_v46  ;;  %v80_v50 = vsel %vm77_vm1, %v69_v42, %v79_v47  ;;  %v114_v51 = vpop.permute.xlu0 %113  ;;  %v159_v52 = vpop.permute.xlu1 %158 }
  0x84   :  { %83 = vst [vmem:[#allocation2] sm:$0xcc] %v78_v49  ;;  %84 = vst [vmem:[#allocation2 + $0x8] sm:$0xcc] %v80_v50  ;;  %v118_v54 = vrot.slane %v114_v51, 4  ;;  %v163_v57 = vrot.slane %v159_v52, 4 }
  0x86   :  { %v120_v55 = vsel %vm75_vm0, %v117_v48, %v118_v54  ;;  %v123_v56 = vsel %vm75_vm0, %v118_v54, %v119_v53 }
  0x87   :  { %v122_v58 = vsel %vm121_vm2, %v112_v43, %v120_v55  ;;  %v124_v59 = vsel %vm121_vm2, %v114_v51, %v123_v56  ;;  %v157_v60 = vpop.permute.xlu0 %156  ;;  %v201_v61 = vpop.permute.xlu1 %200 }
  0x88   :  { %127 = vst [vmem:[#allocation2 + $0x20] sm:$0x33] %v122_v58  ;;  %128 = vst [vmem:[#allocation2 + $0x28] sm:$0x33] %v124_v59  ;;  %v162_v62 = vrot.slane %v157_v60, 4  ;;  %v206_v11 = vrot.slane %v201_v61, 4 }
  0x8a   :  { %v165_v63 = vsel %vm75_vm0, %v162_v62, %v163_v57 }
  0x8b   :  { %v167_v0 = vsel %vm166_vm3, %v157_v60, %v165_v63  ;;  %v161_v1 = vpop.permute.xlu0 %160  ;;  %v205_v2 = vpop.permute.xlu1 %204  ;;  %v767_v19 = vld [vmem:[#allocation2] sm:$0xff]  ;;  %v768_v28 = vld [vmem:[#allocation2 + $0x8] sm:$0xff] }
  0x8c   :  { %172 = vst [vmem:[#allocation2 + $0x20] sm:$0xcc] %v167_v0  ;;  %v164_v3 = vrot.slane %v161_v1, 4  ;;  %v208_v6 = vrot.slane %v205_v2, 4 }
  0x8e   :  { %v168_v4 = vsel %vm75_vm0, %v163_v57, %v164_v3 }
  0x8f   :  { %v169_v7 = vsel %vm166_vm3, %v159_v52, %v168_v4  ;;  %v203_v8 = vpop.permute.xlu0 %202  ;;  %v248_v9 = vpop.permute.xlu1 %247 }
  0x90   :  { %173 = vst [vmem:[#allocation2 + $0x28] sm:$0xcc] %v169_v7  ;;  %v207_v12 = vrot.slane %v203_v8, 4  ;;  %v252_v15 = vrot.slane %v248_v9, 4 }
  0x92   :  { %v209_v13 = vsel %vm75_vm0, %v206_v11, %v207_v12  ;;  %v212_v14 = vsel %vm75_vm0, %v207_v12, %v208_v6 }
  0x93   :  { %v211_v16 = vsel %vm210_vm4, %v201_v61, %v209_v13  ;;  %v213_v17 = vsel %vm210_vm4, %v203_v8, %v212_v14  ;;  %v246_v18 = vpop.permute.xlu0 %245  ;;  %v771_v20 = vld [vmem:[#allocation2 + $0x20] sm:$0xff]  ;;  %v290_v21 = vpop.permute.xlu1 %289 }
  0x94   :  { %216 = vst [vmem:[#allocation2 + $0x40] sm:$0x33] %v211_v16  ;;  %217 = vst [vmem:[#allocation2 + $0x48] sm:$0x33] %v213_v17  ;;  %v251_v22 = vrot.slane %v246_v18, 4  ;;  %v1251_v23 = vcombine.high %v767_v19, %v771_v20  ;;  %v1250_v24 = vcombine.low %v767_v19, %v771_v20  ;;  %v295_v40 = vrot.slane %v290_v21, 4 }
  0x96   :  { %v254_v25 = vsel %vm75_vm0, %v251_v22, %v252_v15  ;;  %922 = vmatprep.subr.bf16.mxu0 %v1251_v23 }
  0x97   :  { %v256_v26 = vsel %vm255_vm5, %v246_v18, %v254_v25  ;;  %v250_v27 = vpop.permute.xlu0 %249  ;;  %923 = vmatpush1.bf16.msra.mxu0 %v1250_v24  ;;  %v772_v29 = vld [vmem:[#allocation2 + $0x28] sm:$0xff]  ;;  %v294_v30 = vpop.permute.xlu1 %293 }
  0x98   :  { %261 = vst [vmem:[#allocation2 + $0x40] sm:$0xcc] %v256_v26  ;;  %v253_v31 = vrot.slane %v250_v27, 4  ;;  %v1253_v33 = vcombine.high %v768_v28, %v772_v29  ;;  %v1252_v34 = vcombine.low %v768_v28, %v772_v29  ;;  %v297_v36 = vrot.slane %v294_v30, 4 }
  0x9a   :  { %v257_v35 = vsel %vm75_vm0, %v252_v15, %v253_v31  ;;  %963 = vmatprep.subr.bf16.mxu1 %v1253_v33 }
  0x9b   :  { %v258_v37 = vsel %vm255_vm5, %v248_v9, %v257_v35  ;;  %v292_v38 = vpop.permute.xlu0 %291  ;;  %964 = vmatpush1.bf16.msra.mxu1 %v1252_v34  ;;  %v337_v39 = vpop.permute.xlu1 %336 }
  0x9c   :  { %262 = vst [vmem:[#allocation2 + $0x48] sm:$0xcc] %v258_v37  ;;  %v296_v41 = vrot.slane %v292_v38, 4  ;;  %v341_v44 = vrot.slane %v337_v39, 4 }
  0x9e   :  { %v298_v42 = vsel %vm75_vm0, %v295_v40, %v296_v41  ;;  %v301_v43 = vsel %vm75_vm0, %v296_v41, %v297_v36 }
  0x9f   :  { %v300_v45 = vsel %vm299_vm6, %v290_v21, %v298_v42  ;;  %v302_v46 = vsel %vm299_vm6, %v292_v38, %v301_v43  ;;  %v335_v47 = vpop.permute.xlu0 %334  ;;  %v379_v48 = vpop.permute.xlu1 %378  ;;  %v775_v4 = vld [vmem:[#allocation2 + $0x40] sm:$0xff] }
  0xa0   :  { %305 = vst [vmem:[#allocation2 + $0x60] sm:$0x33] %v300_v45  ;;  %306 = vst [vmem:[#allocation2 + $0x68] sm:$0x33] %v302_v46  ;;  %v340_v49 = vrot.slane %v335_v47, 4  ;;  %v384_v60 = vrot.slane %v379_v48, 4 }
  0xa1   :  { %v1509_v45 = vld [vmem:[%s1571_s1] sm:$0x3] }
  0xa2   :  { %v343_v50 = vsel %vm75_vm0, %v340_v49, %v341_v44 }
  0xa3   :  { %v345_v51 = vsel %vm344_vm7, %v335_v47, %v343_v50  ;;  %v339_v52 = vpop.permute.xlu0 %338  ;;  %v383_v53 = vpop.permute.xlu1 %382  ;;  %v776_v15 = vld [vmem:[#allocation2 + $0x48] sm:$0xff] }
  0xa4   :  { %350 = vst [vmem:[#allocation2 + $0x60] sm:$0xcc] %v345_v51  ;;  %v342_v54 = vrot.slane %v339_v52, 4  ;;  %v386_v56 = vrot.slane %v383_v53, 4 }
  0xa6   :  { %v346_v55 = vsel %vm75_vm0, %v341_v44, %v342_v54 }
  0xa7   :  { %v347_v57 = vsel %vm344_vm7, %v337_v39, %v346_v55  ;;  %v381_v58 = vpop.permute.xlu0 %380  ;;  %v448_v59 = vpop.permute.xlu1 %447 }
  0xa8   :  { %351 = vst [vmem:[#allocation2 + $0x68] sm:$0xcc] %v347_v57  ;;  %v385_v61 = vrot.slane %v381_v58, 4  ;;  %v452_v0 = vrot.slane %v448_v59, 4 }
  0xaa   :  { %v387_v62 = vsel %vm75_vm0, %v384_v60, %v385_v61  ;;  %v390_v63 = vsel %vm75_vm0, %v385_v61, %v386_v56 }
  0xab   :  { %v389_v1 = vsel %vm388_vm8, %v379_v48, %v387_v62  ;;  %v391_v2 = vsel %vm388_vm8, %v381_v58, %v390_v63  ;;  %v446_v3 = vpop.permute.xlu0 %445  ;;  %v779_v6 = vld [vmem:[#allocation2 + $0x60] sm:$0xff]  ;;  %v489_v7 = vpop.permute.xlu1 %488 }
  0xac   :  { %394 = vst [vmem:[#allocation2 + $0x80] sm:$0x33] %v389_v1  ;;  %395 = vst [vmem:[#allocation2 + $0x88] sm:$0x33] %v391_v2  ;;  %v451_v8 = vrot.slane %v446_v3, 4  ;;  %v1259_v9 = vcombine.high %v775_v4, %v779_v6  ;;  %v1258_v11 = vcombine.low %v775_v4, %v779_v6  ;;  %v494_v28 = vrot.slane %v489_v7, 4 }
  0xae   :  { %v454_v12 = vsel %vm75_vm0, %v451_v8, %v452_v0  ;;  %924 = vmatprep.subr.bf16.mxu0 %v1259_v9 }
  0xaf   :  { %v455_v13 = vsel %vm77_vm1, %v446_v3, %v454_v12  ;;  %v450_v14 = vpop.permute.xlu0 %449  ;;  %925 = vmatpush1.bf16.msra.mxu0 %v1258_v11  ;;  %v780_v16 = vld [vmem:[#allocation2 + $0x68] sm:$0xff]  ;;  %v493_v17 = vpop.permute.xlu1 %492 }
  0xb0   :  { %460 = vst [vmem:[#allocation2 + $0x10] sm:$0xcc] %v455_v13  ;;  %v453_v18 = vrot.slane %v450_v14, 4  ;;  %v1261_v19 = vcombine.high %v776_v15, %v780_v16  ;;  %v1260_v20 = vcombine.low %v776_v15, %v780_v16  ;;  %v496_v22 = vrot.slane %v493_v17, 4 }
  0xb2   :  { %v456_v21 = vsel %vm75_vm0, %v452_v0, %v453_v18  ;;  %965 = vmatprep.subr.bf16.mxu1 %v1261_v19 }
  0xb3   :  { %v457_v23 = vsel %vm77_vm1, %v448_v59, %v456_v21  ;;  %v491_v24 = vpop.permute.xlu0 %490  ;;  %966 = vmatpush1.bf16.msra.mxu1 %v1260_v20  ;;  %v783_v25 = vld [vmem:[#allocation2 + $0x80] sm:$0x33]  ;;  %v784_v26 = vld [vmem:[#allocation2 + $0x88] sm:$0x33]  ;;  %v535_v27 = vpop.permute.xlu1 %534 }
  0xb4   :  { %461 = vst [vmem:[#allocation2 + $0x18] sm:$0xcc] %v457_v23  ;;  %v495_v29 = vrot.slane %v491_v24, 4  ;;  %v1267_v30 = vcombine.high %v783_v25, %v783_v25  ;;  %v1269_v31 = vcombine.high %v784_v26, %v784_v26  ;;  %v1266_v33 = vcombine.low %v783_v25, %v783_v25 }
  0xb5   :  { %v1268_v34 = vcombine.low %v784_v26, %v784_v26  ;;  %v539_v37 = vrot.slane %v535_v27, 4 }
  0xb6   :  { %v497_v35 = vsel %vm75_vm0, %v494_v28, %v495_v29  ;;  %v499_v36 = vsel %vm75_vm0, %v495_v29, %v496_v22  ;;  %1274 = vmatprep.subr.msk.bf16.mxu0 %vm897_vm9, %v1267_v30  ;;  %1276 = vmatprep.subr.msk.bf16.mxu1 %vm897_vm9, %v1269_v31  ;;  %v899_v41 = vsel %vm897_vm9, %v1266_v33, 0 }
  0xb7   :  { %v498_v38 = vsel %vm121_vm2, %v489_v7, %v497_v35  ;;  %v500_v39 = vsel %vm121_vm2, %v491_v24, %v499_v36  ;;  %v533_v40 = vpop.permute.xlu0 %532  ;;  %v905_v42 = vsel %vm897_vm9, %v1268_v34, 0  ;;  %v576_v43 = vpop.permute.xlu1 %575  ;;  %927 = vmatpush1.bf16.msra.mxu0 %v899_v41  ;;  %v769_v63 = vld [vmem:[#allocation2 + $0x10] sm:$0xff] }
  0xb8   :  { %503 = vst [vmem:[#allocation2 + $0x30] sm:$0x33] %v498_v38  ;;  %504 = vst [vmem:[#allocation2 + $0x38] sm:$0x33] %v500_v39  ;;  %v538_v44 = vrot.slane %v533_v40, 4  ;;  %968 = vmatpush1.bf16.msra.mxu1 %v905_v42  ;;  %v581_v56 = vrot.slane %v576_v43, 4 }
  0xba   :  { %v541_v46 = vsel %vm75_vm0, %v538_v44, %v539_v37  ;;  %1275 = vmatmul.mubr.msk.bf16.vlgmr.msra.gmra.mrb[0].mxu0 %vm893_vm10, %v1509_v45 }
  0xbb   :  { %v542_v47 = vsel %vm166_vm3, %v533_v40, %v541_v46  ;;  %v537_v48 = vpop.permute.xlu0 %536  ;;  %v580_v49 = vpop.permute.xlu1 %579  ;;  %1277 = vmatmul.mubr.msk.bf16.vlgmr.msra.gmra.mrb[0].mxu1 %vm893_vm10, %v1509_v45  ;;  %1036 = vmatprep.mubr.bf16.mxu0 %v1327_v32  ;;  %v770_v9 = vld [vmem:[#allocation2 + $0x18] sm:$0xff] }
  0xbc   :  { %547 = vst [vmem:[#allocation2 + $0x30] sm:$0xcc] %v542_v47  ;;  %v540_v50 = vrot.slane %v537_v48, 4  ;;  %1077 = vmatprep.mubr.bf16.mxu1 %v1327_v32  ;;  %v583_v52 = vrot.slane %v580_v49, 4 }
  0xbe   :  { %v543_v51 = vsel %vm75_vm0, %v539_v37, %v540_v50 }
  0xbf   :  { %v544_v53 = vsel %vm166_vm3, %v535_v27, %v543_v51  ;;  %v578_v54 = vpop.permute.xlu0 %577  ;;  %v622_v55 = vpop.permute.xlu1 %621 }
  0xc0   :  { %548 = vst [vmem:[#allocation2 + $0x38] sm:$0xcc] %v544_v53  ;;  %v582_v57 = vrot.slane %v578_v54, 4  ;;  %v626_v60 = vrot.slane %v622_v55, 4 }
  0xc2   :  { %v584_v58 = vsel %vm75_vm0, %v581_v56, %v582_v57  ;;  %v586_v59 = vsel %vm75_vm0, %v582_v57, %v583_v52 }
  0xc3   :  { %v585_v61 = vsel %vm210_vm4, %v576_v43, %v584_v58  ;;  %v587_v62 = vsel %vm210_vm4, %v578_v54, %v586_v59  ;;  %v620_v32 = vpop.permute.xlu0 %619  ;;  %v773_v0 = vld [vmem:[#allocation2 + $0x30] sm:$0xff]  ;;  %v663_v1 = vpop.permute.xlu1 %662 }
  0xc4   :  { %590 = vst [vmem:[#allocation2 + $0x50] sm:$0x33] %v585_v61  ;;  %591 = vst [vmem:[#allocation2 + $0x58] sm:$0x33] %v587_v62  ;;  %v625_v2 = vrot.slane %v620_v32, 4  ;;  %v1254_v3 = vcombine.low %v769_v63, %v773_v0  ;;  %v1255_v4 = vcombine.high %v769_v63, %v773_v0  ;;  %v668_v21 = vrot.slane %v663_v1, 4 }
  0xc5   :  { %v1114_v63 = vsub.s32 0, %v1360_v5  ;;  %v1118_v0 = vsub.s32 1, %v1360_v5 }
  0xc6   :  { %v628_v6 = vsel %vm75_vm0, %v625_v2, %v626_v60  ;;  %1004 = vmatprep.subr.bf16.mxu0 %v1255_v4  ;;  %v1110_v2 = vld [vmem:[%s1572_s3] sm:$0xf]  ;;  %v1126_v4 = vsub.s32 3, %v1360_v5 }
  0xc7   :  { %v629_v7 = vsel %vm255_vm5, %v620_v32, %v628_v6  ;;  %v624_v8 = vpop.permute.xlu0 %623  ;;  %1005 = vmatpush1.bf16.msra.mxu0 %v1254_v3  ;;  %v774_v11 = vld [vmem:[#allocation2 + $0x38] sm:$0xff]  ;;  %v667_v12 = vpop.permute.xlu1 %666  ;;  %v1122_v3 = vsub.s32 2, %v1360_v5 }
  0xc8   :  { %634 = vst [vmem:[#allocation2 + $0x50] sm:$0xcc] %v629_v7  ;;  %v627_v13 = vrot.slane %v624_v8, 4  ;;  %v1256_v14 = vcombine.low %v770_v9, %v774_v11  ;;  %v1257_v15 = vcombine.high %v770_v9, %v774_v11  ;;  %v670_v17 = vrot.slane %v667_v12, 4 }
  0xc9   :  { %v1115_v11 = vrot.slane %v1110_v2, %v1114_v63  ;;  %v1119_v12 = vrot.slane %v1110_v2, %v1118_v0 }
  0xca   :  { %v630_v16 = vsel %vm75_vm0, %v626_v60, %v627_v13  ;;  %1045 = vmatprep.subr.bf16.mxu1 %v1257_v15 }
  0xcb   :  { %v631_v18 = vsel %vm255_vm5, %v622_v55, %v630_v16  ;;  %v665_v19 = vpop.permute.xlu0 %664  ;;  %1046 = vmatpush1.bf16.msra.mxu1 %v1256_v14  ;;  %v709_v20 = vpop.permute.xlu1 %708  ;;  %v1123_v16 = vrot.slane %v1110_v2, %v1122_v3 }
  0xcc   :  { %635 = vst [vmem:[#allocation2 + $0x58] sm:$0xcc] %v631_v18  ;;  %v669_v22 = vrot.slane %v665_v19, 4  ;;  %v713_v25 = vrot.slane %v709_v20, 4 }
  0xce   :  { %v671_v23 = vsel %vm75_vm0, %v668_v21, %v669_v22  ;;  %v673_v24 = vsel %vm75_vm0, %v669_v22, %v670_v17  ;;  %v1127_v17 = vrot.slane %v1110_v2, %v1126_v4 }
  0xcf   :  { %v672_v26 = vsel %vm299_vm6, %v663_v1, %v671_v23  ;;  %v674_v27 = vsel %vm299_vm6, %v665_v19, %v673_v24  ;;  %v707_v28 = vpop.permute.xlu0 %706  ;;  %v750_v29 = vpop.permute.xlu1 %749  ;;  %v777_v48 = vld [vmem:[#allocation2 + $0x50] sm:$0xff] }
  0xd0   :  { %677 = vst [vmem:[#allocation2 + $0x70] sm:$0x33] %v672_v26  ;;  %678 = vst [vmem:[#allocation2 + $0x78] sm:$0x33] %v674_v27  ;;  %v712_v30 = vrot.slane %v707_v28, 4  ;;  %v755_v41 = vrot.slane %v750_v29, 4 }
  0xd2   :  { %v715_v31 = vsel %vm75_vm0, %v712_v30, %v713_v25 }
  0xd3   :  { %v716_v33 = vsel %vm344_vm7, %v707_v28, %v715_v31  ;;  %v711_v34 = vpop.permute.xlu0 %710  ;;  %v754_v35 = vpop.permute.xlu1 %753  ;;  %v778_v52 = vld [vmem:[#allocation2 + $0x58] sm:$0xff] }
  0xd4   :  { %721 = vst [vmem:[#allocation2 + $0x70] sm:$0xcc] %v716_v33  ;;  %v714_v36 = vrot.slane %v711_v34, 4  ;;  %v757_v38 = vrot.slane %v754_v35, 4 }
  0xd6   :  { %v717_v37 = vsel %vm75_vm0, %v713_v25, %v714_v36 }
  0xd7   :  { %v718_v39 = vsel %vm344_vm7, %v709_v20, %v717_v37  ;;  %v752_v40 = vpop.permute.xlu0 %751 }
  0xd8   :  { %722 = vst [vmem:[#allocation2 + $0x78] sm:$0xcc] %v718_v39  ;;  %v756_v42 = vrot.slane %v752_v40, 4  ;;  %v1163_v39 = vld [vmem:[%s1572_s3] sm:$0xf] }
  0xda   :  { %v758_v43 = vsel %vm75_vm0, %v755_v41, %v756_v42  ;;  %v760_v44 = vsel %vm75_vm0, %v756_v42, %v757_v38 }
  0xdb   :  { %v759_v46 = vsel %vm388_vm8, %v750_v29, %v758_v43  ;;  %v761_v47 = vsel %vm388_vm8, %v752_v40, %v760_v44  ;;  %v781_v49 = vld [vmem:[#allocation2 + $0x70] sm:$0xff]  ;;  %v1168_v43 = vrot.slane %v1163_v39, %v1114_v63 }
  0xdc   :  { %764 = vst [vmem:[#allocation2 + $0x90] sm:$0x33] %v759_v46  ;;  %765 = vst [vmem:[#allocation2 + $0x98] sm:$0x33] %v761_v47  ;;  %v1262_v50 = vcombine.low %v777_v48, %v781_v49  ;;  %v1263_v51 = vcombine.high %v777_v48, %v781_v49  ;;  %v1176_v46 = vrot.slane %v1163_v39, %v1122_v3 }
  0xde   :  { %1006 = vmatprep.subr.bf16.mxu0 %v1263_v51 }
  0xdf   :  { %1007 = vmatpush1.bf16.msra.mxu0 %v1262_v50  ;;  %v782_v53 = vld [vmem:[#allocation2 + $0x78] sm:$0xff]  ;;  %v1172_v50 = vrot.slane %v1163_v39, %v1118_v0 }
  0xe0   :  { %v1264_v54 = vcombine.low %v778_v52, %v782_v53  ;;  %v1265_v55 = vcombine.high %v778_v52, %v782_v53  ;;  %v1180_v52 = vrot.slane %v1163_v39, %v1126_v4 }
  0xe2   :  { %1047 = vmatprep.subr.bf16.mxu1 %v1265_v55 }
  0xe3   :  { %1048 = vmatpush1.bf16.msra.mxu1 %v1264_v54  ;;  %v785_v56 = vld [vmem:[#allocation2 + $0x90] sm:$0x33]  ;;  %v786_v57 = vld [vmem:[#allocation2 + $0x98] sm:$0x33] }
  0xe4   :  { %v1271_v58 = vcombine.high %v785_v56, %v785_v56  ;;  %v1273_v59 = vcombine.high %v786_v57, %v786_v57  ;;  %v1270_v60 = vcombine.low %v785_v56, %v785_v56  ;;  %v1272_v61 = vcombine.low %v786_v57, %v786_v57 }
  0xe6   :  { %1278 = vmatprep.subr.msk.bf16.mxu0 %vm897_vm9, %v1271_v58  ;;  %1280 = vmatprep.subr.msk.bf16.mxu1 %vm897_vm9, %v1273_v59  ;;  %v911_v62 = vsel %vm897_vm9, %v1270_v60, 0  ;;  %v917_v32 = vsel %vm897_vm9, %v1272_v61, 0 }
  0xe7   :  { %1009 = vmatpush1.bf16.msra.mxu0 %v911_v62  ;;  %1050 = vmatpush1.bf16.msra.mxu1 %v917_v32 }
  0xe8   :  { %v791_v1 = vpop.permute.xlu0 %790 }
  0xea   :  { %1279 = vmatmul.mubr.msk.bf16.vlgmr.msra.gmra.mrb[4].mxu0 %vm893_vm10, %v1509_v45  ;;  %1281 = vmatmul.mubr.msk.bf16.vlgmr.msra.gmra.mrb[4].mxu1 %vm893_vm10, %v1509_v45 }
 0x18d   :  { %v956_v6 = vpop.f32.mrb[0].mxu0 }
 0x18e   :  { %v997_v7 = vpop.f32.mrb[0].mxu1  ;;  %v957_v8 = vadd.f32 %v956_v6, %v791_v1  ;;  %v958_v9 = vpop.f32.mrb[1].mxu0 }
 0x18f   :  { %v998_v45 = vadd.f32 %v997_v7, %v791_v1  ;;  %v999_v13 = vpop.f32.mrb[1].mxu1  ;;  %v959_v14 = vadd.f32 %v958_v9, %v791_v1  ;;  %v960_v18 = vpop.f32.mrb[2].mxu0 }
 0x190   :  { %v1000_v15 = vadd.f32 %v999_v13, %v791_v1  ;;  %v1001_v19 = vpop.f32.mrb[2].mxu1  ;;  %vm1086_vm11 = vcmp.gt.f32.partialorder %v957_v8, 0.0  ;;  %v1094_v20 = vmul.f32 0.2, %v957_v8  ;;  %v961_v25 = vpop.f32.mrb[3].mxu0 }
 0x191   :  { %vm1088_vm12 = vcmp.gt.f32.partialorder %v998_v45, 0.0  ;;  %v1096_v21 = vmul.f32 0.2, %v998_v45  ;;  %vm1087_vm13 = vcmp.gt.f32.partialorder %v959_v14, 0.0  ;;  %v1095_v5 = vmul.f32 0.2, %v959_v14 }
 0x192   :  { %vm1089_vm14 = vcmp.gt.f32.partialorder %v1000_v15, 0.0  ;;  %v1097_v22 = vmul.f32 0.2, %v1000_v15  ;;  %v1102_v23 = vsel %vm1086_vm11, %v957_v8, %v1094_v20  ;;  %v1002_v26 = vpop.f32.mrb[3].mxu1 }
 0x193   :  { %v1104_v24 = vsel %vm1088_vm12, %v998_v45, %v1096_v21  ;;  %v1103_v27 = vsel %vm1087_vm13, %v959_v14, %v1095_v5  ;;  %v1132_v28 = vmul.f32 %v1115_v11, %v1102_v23 }
 0x194   :  { %v1105_v29 = vsel %vm1089_vm14, %v1000_v15, %v1097_v22  ;;  %v1134_v30 = vmul.f32 %v1123_v16, %v1104_v24  ;;  %v1133_v31 = vmul.f32 %v1119_v12, %v1103_v27 }
 0x195   :  { %v1135_v33 = vmul.f32 %v1127_v17, %v1105_v29 }
 0x196   :  { %v1282_v34 = vpack.c.bf16 %v1133_v31, %v1132_v28 }
 0x197   :  { %v1283_v35 = vpack.c.bf16 %v1135_v33, %v1134_v30 }
 0x198   :  { %v1152_v36 = vrot.slane %v1282_v34, %v1366_v10 }
 0x199   :  { %v1159_v37 = vrot.slane %v1283_v35, %v1366_v10 }
 0x19b   :  { %v1160_v38 = vcombine.low %v1152_v36, %v1159_v37 }
 0x19d   :  { %1162 = vst [vmem:[%s1573_s4] sm:$0xff] %v1160_v38 }
 0x1bd   :  { %v1038_v40 = vpop.f32.mrb[4].mxu0  ;;  %v1079_v41 = vpop.f32.mrb[4].mxu1 }
 0x1be   :  { %v1039_v42 = vadd.f32 %v1038_v40, %v791_v1  ;;  %v1080_v44 = vadd.f32 %v1079_v41, %v791_v1  ;;  %v1040_v47 = vpop.f32.mrb[5].mxu0  ;;  %v1081_v48 = vpop.f32.mrb[5].mxu1 }
 0x1bf   :  { %v1041_v49 = vadd.f32 %v1040_v47, %v791_v1  ;;  %v1082_v51 = vadd.f32 %v1081_v48, %v791_v1  ;;  %v1042_v53 = vpop.f32.mrb[6].mxu0  ;;  %v1083_v54 = vpop.f32.mrb[6].mxu1 }
 0x1c0   :  { %vm1090_vm15 = vcmp.gt.f32.partialorder %v1039_v42, 0.0  ;;  %v1098_v55 = vmul.f32 0.2, %v1039_v42  ;;  %vm1092_vm0 = vcmp.gt.f32.partialorder %v1080_v44, 0.0  ;;  %v1100_v56 = vmul.f32 0.2, %v1080_v44 }
 0x1c1   :  { %vm1091_vm1 = vcmp.gt.f32.partialorder %v1041_v49, 0.0  ;;  %v1099_v57 = vmul.f32 0.2, %v1041_v49  ;;  %vm1093_vm2 = vcmp.gt.f32.partialorder %v1082_v51, 0.0  ;;  %v1101_v58 = vmul.f32 0.2, %v1082_v51 }
 0x1c2   :  { %v1106_v59 = vsel %vm1090_vm15, %v1039_v42, %v1098_v55  ;;  %v1108_v60 = vsel %vm1092_vm0, %v1080_v44, %v1100_v56  ;;  %v1043_v61 = vpop.f32.mrb[7].mxu0  ;;  %v1084_v62 = vpop.f32.mrb[7].mxu1 }
 0x1c3   :  { %v1185_v32 = vmul.f32 %v1168_v43, %v1106_v59  ;;  %v1187_v63 = vmul.f32 %v1176_v46, %v1108_v60  ;;  %v1107_v2 = vsel %vm1091_vm1, %v1041_v49, %v1099_v57  ;;  %v1109_v0 = vsel %vm1093_vm2, %v1082_v51, %v1101_v58 }
 0x1c4   :  { %v1186_v1 = vmul.f32 %v1172_v50, %v1107_v2  ;;  %v1188_v3 = vmul.f32 %v1180_v52, %v1109_v0 }
 0x1c6   :  { %v1284_v4 = vpack.c.bf16 %v1186_v1, %v1185_v32  ;;  %v1285_v6 = vpack.c.bf16 %v1188_v3, %v1187_v63 }
 0x1c8   :  { %v1205_v7 = vrot.slane %v1284_v4, %v1366_v10  ;;  %v1212_v8 = vrot.slane %v1285_v6, %v1366_v10 }
 0x1ca   :  { %v1213_v9 = vcombine.low %v1205_v7, %v1212_v8 }
 0x1cc   :  { %1286 = vst [vmem:[%s1573_s4 + $0x8] sm:$0xff] %v1213_v9 }

</bundles_post_ra>
